<compile_context>
chip_gen: v5e
topology: v5e:2x2
jax: 0.10.0
libtpu: 0.0.40
codegen_flags: <defaults>
</compile_context>

<pallas_src>
import jax
import jax.numpy as jnp
import numpy as np
from jax.experimental import pallas as pl
from jax.experimental.pallas import tpu as pltpu

MAX_INPUT_LEN = 25
EMBED_DIM = 32
VOCAB = 50
DEFAULT_B_TILE = 256   # sweep 256/512; 256 keeps all intermediates well under the 48 MiB
                       # explicit VMEM budget on every generation (v7x: 64 MiB physical).


def _round_up(x, m):
    return (x + m - 1) // m * m


def _vmem_limit_bytes():
    # ~48 MiB fits inside v7x's 64 MiB physical VMEM and is far below v5e/v6e's 128 MiB.
    try:
        cap = pltpu.get_tpu_info().vmem_capacity_bytes
    except Exception:          # query unavailable -> assume the smallest (v7x) physical VMEM
        cap = 64 * 1024 * 1024
    return int(min(48 * 1024 * 1024, (cap * 3) // 4))


def _flatten_selector():
    # Torch Flatten of (B, C=16, L=6): out[b, c*6 + l] = h[l, b, c].  Padded to 128 lanes
    # so the kernel's output store is a full-width unmasked write.
    sel = np.zeros((6, 16, 128), np.float32)
    for l in range(6):
        for c in range(16):
            sel[l, c, c * 6 + l] = 1.0
    return jnp.asarray(sel)


def _cnn_encoder_kernel(ids_ref, emb_ref, w1, b1, w2, b2, w3, b3, w4, b4,
                        sel_ref, o_ref):
    """One batch tile.

    ids_ref: (Bt, S) int32 item ids (batch-leading so the batch tiles along sublanes).
    emb_ref: (V, E) bf16 resident embedding table.
    wN:      (3, Cin, Cout) bf16 conv taps (tap k multiplies input position l-1+k).
    bN:      (1, Cout) f32 biases.
    sel_ref: (6, 16, 128) f32 0/1 flatten selector.
    o_ref:   (Bt, 128) f32; columns 96..127 are zero and sliced off by the wrapper.
    """
    Bt, S = ids_ref.shape
    V, E = emb_ref.shape

    # ---- in-kernel embedding gather: one-hot (S*Bt, V) @ (V, E) on the MXU -------------
    ids_t = ids_ref[...].T                                             # (S, Bt)
    onehot = (ids_t[:, :, None] ==
              jax.lax.broadcasted_iota(jnp.int32, (S, Bt, V), 2))      # (S, Bt, V) bool
    x = jnp.dot(onehot.astype(jnp.bfloat16).reshape(S * Bt, V), emb_ref[...],
                preferred_element_type=jnp.float32).reshape(S, Bt, E)  # (S, Bt, E) f32

    def conv_relu(h, w_ref, b_ref):
        # h: (L, B, Cin) f32, seq-leading / channel-last.  Three accumulating narrow-K
        # bf16 matmuls (one per tap): no non-lane-aligned im2col concat; the +-1 shifts
        # are leading-dim (whole-vreg) moves.  f32 accumulation, bias + ReLU in f32.
        L, B_, Cin = h.shape
        Cout = w_ref.shape[-1]
        hb = h.astype(jnp.bfloat16)
        z = jnp.zeros((1, B_, Cin), jnp.bfloat16)
        h_prev = jnp.concatenate([z, hb[:L - 1]], axis=0)              # input[l-1] (tap 0)
        h_next = jnp.concatenate([hb[1:], z], axis=0)                  # input[l+1] (tap 2)
        M = L * B_
        y = jnp.dot(h_prev.reshape(M, Cin), w_ref[0], preferred_element_type=jnp.float32)
        y += jnp.dot(hb.reshape(M, Cin), w_ref[1], preferred_element_type=jnp.float32)
        y += jnp.dot(h_next.reshape(M, Cin), w_ref[2], preferred_element_type=jnp.float32)
        y = jnp.maximum(y + b_ref[...], 0.0)
        return y.reshape(L, B_, Cout)

    def maxpool2(h):
        # MaxPool1d(kernel=2, stride=2) along the leading seq axis (odd tail row dropped).
        L, B_, C = h.shape
        Lo = L // 2
        hp = h[:2 * Lo].reshape(Lo, 2, B_, C)                          # leading-dim regroup
        return jnp.maximum(hp[:, 0], hp[:, 1])

    if 2 <= S <= MAX_INPUT_LEN - 3:
        # Fast path: with F.pad zeros at positions >= S, conv1 rows >= S+1 and conv2 rows
        # >= S+2 are batch-independent constants; layers 1-2 only run on ~S+2 rows.
        x1 = jnp.concatenate([x, jnp.zeros((1, Bt, E), jnp.float32)], axis=0)   # S+1 rows
        h1 = conv_relu(x1, w1, b1)                                     # conv1 rows 0..S exact
        c1 = jnp.maximum(b1[...], 0.0)                                 # conv1 rows >= S+1
        h1e = jnp.concatenate(
            [h1, jnp.broadcast_to(c1[:, None, :], (2, Bt, c1.shape[-1]))], axis=0)
        h2_head = conv_relu(h1e, w2, b2)[:S + 2]                       # conv2 rows 0..S+1 exact
        w2f = w2[...].astype(jnp.float32)
        c2 = jnp.maximum(
            b2[...] + jnp.dot(c1, w2f[0] + w2f[1] + w2f[2],
                              preferred_element_type=jnp.float32), 0.0)   # conv2 rows S+2..23
        tail = (MAX_INPUT_LEN - 1) - (S + 2)
        parts = [h2_head]
        if tail > 0:
            parts.append(jnp.broadcast_to(c2[:, None, :], (tail, Bt, c2.shape[-1])))
        h2 = jnp.concatenate(parts, axis=0) if len(parts) > 1 else parts[0]   # 24 rows
        # conv2 row 24 is dropped by MaxPool1d(2,2) on length 25, so it is never built.
    else:
        # Plain path (S >= 23 or degenerate S < 2): fused F.pad + full-length convolutions.
        if S < MAX_INPUT_LEN:
            x = jnp.concatenate(
                [x, jnp.zeros((MAX_INPUT_LEN - S, Bt, E), jnp.float32)], axis=0)
        h1 = conv_relu(x, w1, b1)                                      # (25, Bt, 64)
        h2 = conv_relu(h1, w2, b2)                                     # (25, Bt, 32)

    h = maxpool2(h2)                                                   # (12, Bt, 32)
    h = conv_relu(h, w3, b3)                                           # (12, Bt, 32)
    h = conv_relu(h, w4, b4)                                           # (12, Bt, 16)
    h = maxpool2(h)                                                    # (6,  Bt, 16)

    # Flatten in torch order via the precomputed selector: 6 tiny accumulating matmuls
    # and one lane-dense (Bt, 128) store.
    acc = jnp.dot(h[0], sel_ref[0], preferred_element_type=jnp.float32)
    for l in range(1, 6):
        acc = acc + jnp.dot(h[l], sel_ref[l], preferred_element_type=jnp.float32)
    o_ref[...] = acc.astype(o_ref.dtype)


def cnn_state_agg_forward(items, emb_table, params, *, b_tile=DEFAULT_B_TILE):
    """items: (S, B) int ids (seq-major, batch_first=False convention).  Returns (B, 96)."""
    # TODO(synk): use_rewards_concat one-hot reward concat branch not implemented
    #             (with_rewards=False path only).
    if items.ndim == 1:                      # mirrors RNNStateAgg.check_input unsqueeze_
        items = items[:, None]
    S, B = items.shape
    assert 1 <= S <= MAX_INPUT_LEN
    V, E = emb_table.shape

    # Batch tile: multiple of 8 sublanes; keep >= 2 grid steps when B allows so v7x's
    # second TensorCore gets work under dimension_semantics=("parallel",).
    bt = _round_up(min(b_tile, B), 8)
    if B > 8:
        bt = min(bt, _round_up(-(-B // 2), 8))
    Bp = _round_up(B, bt)

    # Pad the int32 ids (4 B/elem), never an f32 embedded tensor; batch-leading so the
    # batch dim tiles along sublanes and the (bt, S) block is always legal.
    ids = jnp.transpose(items.astype(jnp.int32))             # (B, S)
    if Bp != B:
        ids = jnp.pad(ids, ((0, Bp - B), (0, 0)))            # padded rows discarded below

    flat_inputs = [ids, emb_table.astype(jnp.bfloat16)]
    for i in range(0, 8, 2):
        flat_inputs.append(params[i].astype(jnp.bfloat16))       # (3, Cin, Cout) conv taps
        flat_inputs.append(params[i + 1].astype(jnp.float32))    # (1, Cout) bias stays f32
    flat_inputs.append(_flatten_selector())                      # (6, 16, 128) f32

    def resident(arr):
        nd = arr.ndim
        return pl.BlockSpec(arr.shape, lambda i, nd=nd: (0,) * nd)

    in_specs = ([pl.BlockSpec((bt, S), lambda i: (i, 0))]
                + [resident(a) for a in flat_inputs[1:]])

    out = pl.pallas_call(
        _cnn_encoder_kernel,
        out_shape=jax.ShapeDtypeStruct((Bp, 128), jnp.float32),
        grid=(Bp // bt,),
        in_specs=in_specs,
        out_specs=pl.BlockSpec((bt, 128), lambda i: (i, 0)),
        compiler_params=pltpu.CompilerParams(
            dimension_semantics=("parallel",),
            vmem_limit_bytes=_vmem_limit_bytes()),
    )(*flat_inputs)
    return out[:B, :96]


def init_params(key):
    """Deterministic Conv1d params.  W: (K=3, Cin, Cout), b: (1, Cout)."""
    shapes = [(EMBED_DIM, 64), (64, 32), (32, 32), (32, 16)]
    params = []
    for cin, cout in shapes:
        kw, kb, key = jax.random.split(key, 3)
        bound = 1.0 / np.sqrt(cin * 3)
        params.append(jax.random.uniform(kw, (3, cin, cout), jnp.float32, -bound, bound))
        params.append(jax.random.uniform(kb, (1, cout), jnp.float32, -bound, bound))
    return params, key


def ref_forward(items, emb_table, params):
    """Pure-JAX f32 reference mirroring the PyTorch NCW pipeline (correctness check)."""
    w1, b1, w2, b2, w3, b3, w4, b4 = params
    t = jnp.transpose(emb_table[items], (1, 2, 0))            # (B, E, S)
    t = jnp.pad(t, ((0, 0), (0, 0), (0, MAX_INPUT_LEN - t.shape[-1])))

    def conv(h, w, b):
        wk = jnp.transpose(w, (2, 1, 0))                      # (Cout, Cin, 3)
        y = jax.lax.conv_general_dilated(h, wk, (1,), ((1, 1),),
                                         dimension_numbers=('NCH', 'OIH', 'NCH'))
        return y + b.reshape(1, -1, 1)

    def pool(h):
        Lo = h.shape[-1] // 2
        return h[..., :2 * Lo].reshape(h.shape[0], h.shape[1], Lo, 2).max(-1)

    h = jax.nn.relu(conv(t, w1, b1))
    h = jax.nn.relu(conv(h, w2, b2))
    h = pool(h)
    h = jax.nn.relu(conv(h, w3, b3))
    h = jax.nn.relu(conv(h, w4, b4))
    h = pool(h)
    return h.reshape(h.shape[0], -1)


if __name__ == "__main__":
    key = jax.random.PRNGKey(0)
    params, key = init_params(key)
    k_emb, k1, k2, k3 = jax.random.split(key, 4)
    emb_table = jax.random.normal(k_emb, (VOCAB, EMBED_DIM), jnp.float32)

    # bf16 matmul operands (f32 accumulation), so compare with a loosened tolerance.
    TOL = dict(rtol=5e-2, atol=5e-2)

    # Small shapes consistent with the module: seq=8, batch=2, embed=32.
    S, B = 8, 2
    items = jax.random.randint(k1, (S, B), 0, VOCAB, jnp.int32)
    out = jax.block_until_ready(cnn_state_agg_forward(items, emb_table, params))
    assert out.shape == (B, 96)
    np.testing.assert_allclose(np.asarray(out),
                               np.asarray(ref_forward(items, emb_table, params)), **TOL)

    # Multi-step batch grid + partial-tile (padded ids) path.
    items2 = jax.random.randint(k2, (8, 20), 0, VOCAB, jnp.int32)
    out2 = jax.block_until_ready(
        cnn_state_agg_forward(items2, emb_table, params, b_tile=8))
    np.testing.assert_allclose(np.asarray(out2),
                               np.asarray(ref_forward(items2, emb_table, params)), **TOL)

    # Full-length sequence exercises the plain (no constant-row shortcut) path.
    items3 = jax.random.randint(k3, (MAX_INPUT_LEN, 4), 0, VOCAB, jnp.int32)
    out3 = jax.block_until_ready(cnn_state_agg_forward(items3, emb_table, params))
    np.testing.assert_allclose(np.asarray(out3),
                               np.asarray(ref_forward(items3, emb_table, params)), **TOL)

    print("KERNEL_OK")
</pallas_src>

<mosaic_0001>
module attributes {stable_mosaic.version = 11 : i64} {
  func.func @_cnn_encoder_kernel(%arg0: i32, %arg1: memref<8x8xi32, #tpu.memory_space<vmem>>, %arg2: memref<50x32xbf16, #tpu.memory_space<vmem>>, %arg3: memref<3x32x64xbf16, #tpu.memory_space<vmem>>, %arg4: memref<1x64xf32, #tpu.memory_space<vmem>>, %arg5: memref<3x64x32xbf16, #tpu.memory_space<vmem>>, %arg6: memref<1x32xf32, #tpu.memory_space<vmem>>, %arg7: memref<3x32x32xbf16, #tpu.memory_space<vmem>>, %arg8: memref<1x32xf32, #tpu.memory_space<vmem>>, %arg9: memref<3x32x16xbf16, #tpu.memory_space<vmem>>, %arg10: memref<1x16xf32, #tpu.memory_space<vmem>>, %arg11: memref<6x16x128xf32, #tpu.memory_space<vmem>>, %arg12: memref<8x128xf32, #tpu.memory_space<vmem>>) attributes {dimension_semantics = [#tpu.dimension_semantics<parallel>], iteration_bounds = array<i64: 1>, scalar_prefetch = 0 : i64, scratch_operands = 0 : i64, tpu.core_type = #tpu.core_type<tc>, window_params = [{transform_indices = @transform_0, window_bounds = array<i64: 8, 8>}, {pipeline_mode = #tpu.pipeline_mode<synchronous>, transform_indices = @transform_1, window_bounds = array<i64: 50, 32>}, {pipeline_mode = #tpu.pipeline_mode<synchronous>, transform_indices = @transform_2, window_bounds = array<i64: 3, 32, 64>}, {pipeline_mode = #tpu.pipeline_mode<synchronous>, transform_indices = @transform_3, window_bounds = array<i64: 1, 64>}, {pipeline_mode = #tpu.pipeline_mode<synchronous>, transform_indices = @transform_4, window_bounds = array<i64: 3, 64, 32>}, {pipeline_mode = #tpu.pipeline_mode<synchronous>, transform_indices = @transform_5, window_bounds = array<i64: 1, 32>}, {pipeline_mode = #tpu.pipeline_mode<synchronous>, transform_indices = @transform_6, window_bounds = array<i64: 3, 32, 32>}, {pipeline_mode = #tpu.pipeline_mode<synchronous>, transform_indices = @transform_7, window_bounds = array<i64: 1, 32>}, {pipeline_mode = #tpu.pipeline_mode<synchronous>, transform_indices = @transform_8, window_bounds = array<i64: 3, 32, 16>}, {pipeline_mode = #tpu.pipeline_mode<synchronous>, transform_indices = @transform_9, window_bounds = array<i64: 1, 16>}, {pipeline_mode = #tpu.pipeline_mode<synchronous>, transform_indices = @transform_10, window_bounds = array<i64: 6, 16, 128>}, {transform_indices = @transform_11, window_bounds = array<i64: 8, 128>}]} {
    %c0 = arith.constant 0 : index
    %c0_0 = arith.constant 0 : index
    %0 = vector.load %arg1[%c0, %c0_0] : memref<8x8xi32, #tpu.memory_space<vmem>>, vector<8x8xi32>
    %1 = tpu.transpose %0, [1, 0] : vector<8x8xi32> -> vector<8x8xi32>
    %2 = vector.shape_cast %1 : vector<8x8xi32> to vector<8x8x1xi32>
    %3 = tpu.iota {dimensions = array<i32: 2>} : vector<8x8x50xi32>
    %4 = vector.broadcast %2 : vector<8x8x1xi32> to vector<8x8x50xi32>
    %5 = arith.cmpi eq, %4, %3 : vector<8x8x50xi32>
    %6 = arith.extui %5 : vector<8x8x50xi1> to vector<8x8x50xi32>
    %7 = arith.sitofp %6 : vector<8x8x50xi32> to vector<8x8x50xf32>
    %8 = arith.truncf %7 : vector<8x8x50xf32> to vector<8x8x50xbf16>
    %9 = vector.shape_cast %8 : vector<8x8x50xbf16> to vector<64x50xbf16>
    %c0_1 = arith.constant 0 : index
    %c0_2 = arith.constant 0 : index
    %10 = vector.load %arg2[%c0_1, %c0_2] : memref<50x32xbf16, #tpu.memory_space<vmem>>, vector<50x32xbf16>
    %cst = arith.constant dense<0.000000e+00> : vector<64x32xf32>
    %11 = tpu.matmul %9, %10, %cst {dimension_numbers = #tpu.dot_dimension_numbers<[1], [0], [0], [1], [0, 0, 1, 1], [], []>} : vector<64x50xbf16>, vector<50x32xbf16>, vector<64x32xf32> -> vector<64x32xf32>
    %12 = vector.shape_cast %11 : vector<64x32xf32> to vector<8x8x32xf32>
    %cst_3 = arith.constant 0.000000e+00 : f32
    %13 = vector.broadcast %cst_3 : f32 to vector<1x8x32xf32>
    %14 = tpu.concatenate %12, %13 in 0 : vector<8x8x32xf32>, vector<1x8x32xf32> -> vector<9x8x32xf32>
    %15 = arith.truncf %14 : vector<9x8x32xf32> to vector<9x8x32xbf16>
    %cst_4 = arith.constant 0.000000e+00 : bf16
    %16 = vector.broadcast %cst_4 : bf16 to vector<1x8x32xbf16>
    %17 = vector.extract_strided_slice %15 {offsets = [0, 0, 0], sizes = [8, 8, 32], strides = [1, 1, 1]} : vector<9x8x32xbf16> to vector<8x8x32xbf16>
    %18 = tpu.concatenate %16, %17 in 0 : vector<1x8x32xbf16>, vector<8x8x32xbf16> -> vector<9x8x32xbf16>
    %19 = vector.extract_strided_slice %15 {offsets = [1, 0, 0], sizes = [8, 8, 32], strides = [1, 1, 1]} : vector<9x8x32xbf16> to vector<8x8x32xbf16>
    %20 = tpu.concatenate %19, %16 in 0 : vector<8x8x32xbf16>, vector<1x8x32xbf16> -> vector<9x8x32xbf16>
    %21 = vector.shape_cast %18 : vector<9x8x32xbf16> to vector<72x32xbf16>
    %c0_5 = arith.constant 0 : index
    %c0_6 = arith.constant 0 : index
    %c0_7 = arith.constant 0 : index
    %22 = vector.load %arg3[%c0_5, %c0_6, %c0_7] : memref<3x32x64xbf16, #tpu.memory_space<vmem>>, vector<1x32x64xbf16>
    %23 = vector.shape_cast %22 : vector<1x32x64xbf16> to vector<32x64xbf16>
    %cst_8 = arith.constant dense<0.000000e+00> : vector<72x64xf32>
    %24 = tpu.matmul %21, %23, %cst_8 {dimension_numbers = #tpu.dot_dimension_numbers<[1], [0], [0], [1], [0, 0, 1, 1], [], []>} : vector<72x32xbf16>, vector<32x64xbf16>, vector<72x64xf32> -> vector<72x64xf32>
    %25 = vector.shape_cast %15 : vector<9x8x32xbf16> to vector<72x32xbf16>
    %c1 = arith.constant 1 : index
    %c0_9 = arith.constant 0 : index
    %c0_10 = arith.constant 0 : index
    %26 = vector.load %arg3[%c1, %c0_9, %c0_10] : memref<3x32x64xbf16, #tpu.memory_space<vmem>>, vector<1x32x64xbf16>
    %27 = vector.shape_cast %26 : vector<1x32x64xbf16> to vector<32x64xbf16>
    %cst_11 = arith.constant dense<0.000000e+00> : vector<72x64xf32>
    %28 = tpu.matmul %25, %27, %cst_11 {dimension_numbers = #tpu.dot_dimension_numbers<[1], [0], [0], [1], [0, 0, 1, 1], [], []>} : vector<72x32xbf16>, vector<32x64xbf16>, vector<72x64xf32> -> vector<72x64xf32>
    %29 = arith.addf %24, %28 : vector<72x64xf32>
    %30 = vector.shape_cast %20 : vector<9x8x32xbf16> to vector<72x32xbf16>
    %c2 = arith.constant 2 : index
    %c0_12 = arith.constant 0 : index
    %c0_13 = arith.constant 0 : index
    %31 = vector.load %arg3[%c2, %c0_12, %c0_13] : memref<3x32x64xbf16, #tpu.memory_space<vmem>>, vector<1x32x64xbf16>
    %32 = vector.shape_cast %31 : vector<1x32x64xbf16> to vector<32x64xbf16>
    %cst_14 = arith.constant dense<0.000000e+00> : vector<72x64xf32>
    %33 = tpu.matmul %30, %32, %cst_14 {dimension_numbers = #tpu.dot_dimension_numbers<[1], [0], [0], [1], [0, 0, 1, 1], [], []>} : vector<72x32xbf16>, vector<32x64xbf16>, vector<72x64xf32> -> vector<72x64xf32>
    %34 = arith.addf %29, %33 : vector<72x64xf32>
    %c0_15 = arith.constant 0 : index
    %c0_16 = arith.constant 0 : index
    %35 = vector.load %arg4[%c0_15, %c0_16] : memref<1x64xf32, #tpu.memory_space<vmem>>, vector<1x64xf32>
    %36 = vector.broadcast %35 : vector<1x64xf32> to vector<72x64xf32>
    %37 = arith.addf %34, %36 : vector<72x64xf32>
    %cst_17 = arith.constant 0.000000e+00 : f32
    %38 = vector.broadcast %cst_17 : f32 to vector<72x64xf32>
    %39 = arith.maximumf %37, %38 : vector<72x64xf32>
    %40 = vector.shape_cast %39 : vector<72x64xf32> to vector<9x8x64xf32>
    %c0_18 = arith.constant 0 : index
    %c0_19 = arith.constant 0 : index
    %41 = vector.load %arg4[%c0_18, %c0_19] : memref<1x64xf32, #tpu.memory_space<vmem>>, vector<1x64xf32>
    %cst_20 = arith.constant 0.000000e+00 : f32
    %42 = vector.broadcast %cst_20 : f32 to vector<1x64xf32>
    %43 = arith.maximumf %41, %42 : vector<1x64xf32>
    %44 = vector.shape_cast %43 : vector<1x64xf32> to vector<1x1x64xf32>
    %45 = vector.shape_cast %44 : vector<1x1x64xf32> to vector<1x1x64xf32>
    %46 = vector.broadcast %45 : vector<1x1x64xf32> to vector<2x8x64xf32>
    %47 = tpu.concatenate %40, %46 in 0 : vector<9x8x64xf32>, vector<2x8x64xf32> -> vector<11x8x64xf32>
    %48 = arith.truncf %47 : vector<11x8x64xf32> to vector<11x8x64xbf16>
    %cst_21 = arith.constant 0.000000e+00 : bf16
    %49 = vector.broadcast %cst_21 : bf16 to vector<1x8x64xbf16>
    %50 = vector.extract_strided_slice %48 {offsets = [0, 0, 0], sizes = [10, 8, 64], strides = [1, 1, 1]} : vector<11x8x64xbf16> to vector<10x8x64xbf16>
    %51 = tpu.concatenate %49, %50 in 0 : vector<1x8x64xbf16>, vector<10x8x64xbf16> -> vector<11x8x64xbf16>
    %52 = vector.extract_strided_slice %48 {offsets = [1, 0, 0], sizes = [10, 8, 64], strides = [1, 1, 1]} : vector<11x8x64xbf16> to vector<10x8x64xbf16>
    %53 = tpu.concatenate %52, %49 in 0 : vector<10x8x64xbf16>, vector<1x8x64xbf16> -> vector<11x8x64xbf16>
    %54 = vector.shape_cast %51 : vector<11x8x64xbf16> to vector<88x64xbf16>
    %c0_22 = arith.constant 0 : index
    %c0_23 = arith.constant 0 : index
    %c0_24 = arith.constant 0 : index
    %55 = vector.load %arg5[%c0_22, %c0_23, %c0_24] : memref<3x64x32xbf16, #tpu.memory_space<vmem>>, vector<1x64x32xbf16>
    %56 = vector.shape_cast %55 : vector<1x64x32xbf16> to vector<64x32xbf16>
    %cst_25 = arith.constant dense<0.000000e+00> : vector<88x32xf32>
    %57 = tpu.matmul %54, %56, %cst_25 {dimension_numbers = #tpu.dot_dimension_numbers<[1], [0], [0], [1], [0, 0, 1, 1], [], []>} : vector<88x64xbf16>, vector<64x32xbf16>, vector<88x32xf32> -> vector<88x32xf32>
    %58 = vector.shape_cast %48 : vector<11x8x64xbf16> to vector<88x64xbf16>
    %c1_26 = arith.constant 1 : index
    %c0_27 = arith.constant 0 : index
    %c0_28 = arith.constant 0 : index
    %59 = vector.load %arg5[%c1_26, %c0_27, %c0_28] : memref<3x64x32xbf16, #tpu.memory_space<vmem>>, vector<1x64x32xbf16>
    %60 = vector.shape_cast %59 : vector<1x64x32xbf16> to vector<64x32xbf16>
    %cst_29 = arith.constant dense<0.000000e+00> : vector<88x32xf32>
    %61 = tpu.matmul %58, %60, %cst_29 {dimension_numbers = #tpu.dot_dimension_numbers<[1], [0], [0], [1], [0, 0, 1, 1], [], []>} : vector<88x64xbf16>, vector<64x32xbf16>, vector<88x32xf32> -> vector<88x32xf32>
    %62 = arith.addf %57, %61 : vector<88x32xf32>
    %63 = vector.shape_cast %53 : vector<11x8x64xbf16> to vector<88x64xbf16>
    %c2_30 = arith.constant 2 : index
    %c0_31 = arith.constant 0 : index
    %c0_32 = arith.constant 0 : index
    %64 = vector.load %arg5[%c2_30, %c0_31, %c0_32] : memref<3x64x32xbf16, #tpu.memory_space<vmem>>, vector<1x64x32xbf16>
    %65 = vector.shape_cast %64 : vector<1x64x32xbf16> to vector<64x32xbf16>
    %cst_33 = arith.constant dense<0.000000e+00> : vector<88x32xf32>
    %66 = tpu.matmul %63, %65, %cst_33 {dimension_numbers = #tpu.dot_dimension_numbers<[1], [0], [0], [1], [0, 0, 1, 1], [], []>} : vector<88x64xbf16>, vector<64x32xbf16>, vector<88x32xf32> -> vector<88x32xf32>
    %67 = arith.addf %62, %66 : vector<88x32xf32>
    %c0_34 = arith.constant 0 : index
    %c0_35 = arith.constant 0 : index
    %68 = vector.load %arg6[%c0_34, %c0_35] : memref<1x32xf32, #tpu.memory_space<vmem>>, vector<1x32xf32>
    %69 = vector.broadcast %68 : vector<1x32xf32> to vector<88x32xf32>
    %70 = arith.addf %67, %69 : vector<88x32xf32>
    %cst_36 = arith.constant 0.000000e+00 : f32
    %71 = vector.broadcast %cst_36 : f32 to vector<88x32xf32>
    %72 = arith.maximumf %70, %71 : vector<88x32xf32>
    %73 = vector.shape_cast %72 : vector<88x32xf32> to vector<11x8x32xf32>
    %74 = vector.extract_strided_slice %73 {offsets = [0, 0, 0], sizes = [10, 8, 32], strides = [1, 1, 1]} : vector<11x8x32xf32> to vector<10x8x32xf32>
    %c0_37 = arith.constant 0 : index
    %c0_38 = arith.constant 0 : index
    %c0_39 = arith.constant 0 : index
    %75 = vector.load %arg5[%c0_37, %c0_38, %c0_39] : memref<3x64x32xbf16, #tpu.memory_space<vmem>>, vector<3x64x32xbf16>
    %76 = arith.extf %75 : vector<3x64x32xbf16> to vector<3x64x32xf32>
    %c0_40 = arith.constant 0 : index
    %c0_41 = arith.constant 0 : index
    %77 = vector.load %arg6[%c0_40, %c0_41] : memref<1x32xf32, #tpu.memory_space<vmem>>, vector<1x32xf32>
    %78 = vector.extract_strided_slice %76 {offsets = [0, 0, 0], sizes = [1, 64, 32], strides = [1, 1, 1]} : vector<3x64x32xf32> to vector<1x64x32xf32>
    %79 = vector.shape_cast %78 : vector<1x64x32xf32> to vector<64x32xf32>
    %80 = vector.extract_strided_slice %76 {offsets = [1, 0, 0], sizes = [1, 64, 32], strides = [1, 1, 1]} : vector<3x64x32xf32> to vector<1x64x32xf32>
    %81 = vector.shape_cast %80 : vector<1x64x32xf32> to vector<64x32xf32>
    %82 = arith.addf %79, %81 : vector<64x32xf32>
    %83 = vector.extract_strided_slice %76 {offsets = [2, 0, 0], sizes = [1, 64, 32], strides = [1, 1, 1]} : vector<3x64x32xf32> to vector<1x64x32xf32>
    %84 = vector.shape_cast %83 : vector<1x64x32xf32> to vector<64x32xf32>
    %85 = arith.addf %82, %84 : vector<64x32xf32>
    %cst_42 = arith.constant dense<0.000000e+00> : vector<1x32xf32>
    %86 = tpu.matmul %43, %85, %cst_42 {dimension_numbers = #tpu.dot_dimension_numbers<[1], [0], [0], [1], [0, 0, 1, 1], [], []>} : vector<1x64xf32>, vector<64x32xf32>, vector<1x32xf32> -> vector<1x32xf32>
    %87 = arith.addf %77, %86 : vector<1x32xf32>
    %cst_43 = arith.constant 0.000000e+00 : f32
    %88 = vector.broadcast %cst_43 : f32 to vector<1x32xf32>
    %89 = arith.maximumf %87, %88 : vector<1x32xf32>
    %90 = vector.shape_cast %89 : vector<1x32xf32> to vector<1x1x32xf32>
    %91 = vector.shape_cast %90 : vector<1x1x32xf32> to vector<1x1x32xf32>
    %92 = vector.broadcast %91 : vector<1x1x32xf32> to vector<14x8x32xf32>
    %93 = tpu.concatenate %74, %92 in 0 : vector<10x8x32xf32>, vector<14x8x32xf32> -> vector<24x8x32xf32>
    %94 = vector.shape_cast %93 : vector<24x8x32xf32> to vector<12x2x8x32xf32>
    %95 = vector.extract_strided_slice %94 {offsets = [0, 0, 0, 0], sizes = [12, 1, 8, 32], strides = [1, 1, 1, 1]} : vector<12x2x8x32xf32> to vector<12x1x8x32xf32>
    %96 = vector.shape_cast %95 : vector<12x1x8x32xf32> to vector<12x8x32xf32>
    %97 = vector.extract_strided_slice %94 {offsets = [0, 1, 0, 0], sizes = [12, 1, 8, 32], strides = [1, 1, 1, 1]} : vector<12x2x8x32xf32> to vector<12x1x8x32xf32>
    %98 = vector.shape_cast %97 : vector<12x1x8x32xf32> to vector<12x8x32xf32>
    %99 = arith.maximumf %96, %98 : vector<12x8x32xf32>
    %100 = arith.truncf %99 : vector<12x8x32xf32> to vector<12x8x32xbf16>
    %cst_44 = arith.constant 0.000000e+00 : bf16
    %101 = vector.broadcast %cst_44 : bf16 to vector<1x8x32xbf16>
    %102 = vector.extract_strided_slice %100 {offsets = [0, 0, 0], sizes = [11, 8, 32], strides = [1, 1, 1]} : vector<12x8x32xbf16> to vector<11x8x32xbf16>
    %103 = tpu.concatenate %101, %102 in 0 : vector<1x8x32xbf16>, vector<11x8x32xbf16> -> vector<12x8x32xbf16>
    %104 = vector.extract_strided_slice %100 {offsets = [1, 0, 0], sizes = [11, 8, 32], strides = [1, 1, 1]} : vector<12x8x32xbf16> to vector<11x8x32xbf16>
    %105 = tpu.concatenate %104, %101 in 0 : vector<11x8x32xbf16>, vector<1x8x32xbf16> -> vector<12x8x32xbf16>
    %106 = vector.shape_cast %103 : vector<12x8x32xbf16> to vector<96x32xbf16>
    %c0_45 = arith.constant 0 : index
    %c0_46 = arith.constant 0 : index
    %c0_47 = arith.constant 0 : index
    %107 = vector.load %arg7[%c0_45, %c0_46, %c0_47] : memref<3x32x32xbf16, #tpu.memory_space<vmem>>, vector<1x32x32xbf16>
    %108 = vector.shape_cast %107 : vector<1x32x32xbf16> to vector<32x32xbf16>
    %cst_48 = arith.constant dense<0.000000e+00> : vector<96x32xf32>
    %109 = tpu.matmul %106, %108, %cst_48 {dimension_numbers = #tpu.dot_dimension_numbers<[1], [0], [0], [1], [0, 0, 1, 1], [], []>} : vector<96x32xbf16>, vector<32x32xbf16>, vector<96x32xf32> -> vector<96x32xf32>
    %110 = vector.shape_cast %100 : vector<12x8x32xbf16> to vector<96x32xbf16>
    %c1_49 = arith.constant 1 : index
    %c0_50 = arith.constant 0 : index
    %c0_51 = arith.constant 0 : index
    %111 = vector.load %arg7[%c1_49, %c0_50, %c0_51] : memref<3x32x32xbf16, #tpu.memory_space<vmem>>, vector<1x32x32xbf16>
    %112 = vector.shape_cast %111 : vector<1x32x32xbf16> to vector<32x32xbf16>
    %cst_52 = arith.constant dense<0.000000e+00> : vector<96x32xf32>
    %113 = tpu.matmul %110, %112, %cst_52 {dimension_numbers = #tpu.dot_dimension_numbers<[1], [0], [0], [1], [0, 0, 1, 1], [], []>} : vector<96x32xbf16>, vector<32x32xbf16>, vector<96x32xf32> -> vector<96x32xf32>
    %114 = arith.addf %109, %113 : vector<96x32xf32>
    %115 = vector.shape_cast %105 : vector<12x8x32xbf16> to vector<96x32xbf16>
    %c2_53 = arith.constant 2 : index
    %c0_54 = arith.constant 0 : index
    %c0_55 = arith.constant 0 : index
    %116 = vector.load %arg7[%c2_53, %c0_54, %c0_55] : memref<3x32x32xbf16, #tpu.memory_space<vmem>>, vector<1x32x32xbf16>
    %117 = vector.shape_cast %116 : vector<1x32x32xbf16> to vector<32x32xbf16>
    %cst_56 = arith.constant dense<0.000000e+00> : vector<96x32xf32>
    %118 = tpu.matmul %115, %117, %cst_56 {dimension_numbers = #tpu.dot_dimension_numbers<[1], [0], [0], [1], [0, 0, 1, 1], [], []>} : vector<96x32xbf16>, vector<32x32xbf16>, vector<96x32xf32> -> vector<96x32xf32>
    %119 = arith.addf %114, %118 : vector<96x32xf32>
    %c0_57 = arith.constant 0 : index
    %c0_58 = arith.constant 0 : index
    %120 = vector.load %arg8[%c0_57, %c0_58] : memref<1x32xf32, #tpu.memory_space<vmem>>, vector<1x32xf32>
    %121 = vector.broadcast %120 : vector<1x32xf32> to vector<96x32xf32>
    %122 = arith.addf %119, %121 : vector<96x32xf32>
    %cst_59 = arith.constant 0.000000e+00 : f32
    %123 = vector.broadcast %cst_59 : f32 to vector<96x32xf32>
    %124 = arith.maximumf %122, %123 : vector<96x32xf32>
    %125 = vector.shape_cast %124 : vector<96x32xf32> to vector<12x8x32xf32>
    %126 = arith.truncf %125 : vector<12x8x32xf32> to vector<12x8x32xbf16>
    %cst_60 = arith.constant 0.000000e+00 : bf16
    %127 = vector.broadcast %cst_60 : bf16 to vector<1x8x32xbf16>
    %128 = vector.extract_strided_slice %126 {offsets = [0, 0, 0], sizes = [11, 8, 32], strides = [1, 1, 1]} : vector<12x8x32xbf16> to vector<11x8x32xbf16>
    %129 = tpu.concatenate %127, %128 in 0 : vector<1x8x32xbf16>, vector<11x8x32xbf16> -> vector<12x8x32xbf16>
    %130 = vector.extract_strided_slice %126 {offsets = [1, 0, 0], sizes = [11, 8, 32], strides = [1, 1, 1]} : vector<12x8x32xbf16> to vector<11x8x32xbf16>
    %131 = tpu.concatenate %130, %127 in 0 : vector<11x8x32xbf16>, vector<1x8x32xbf16> -> vector<12x8x32xbf16>
    %132 = vector.shape_cast %129 : vector<12x8x32xbf16> to vector<96x32xbf16>
    %c0_61 = arith.constant 0 : index
    %c0_62 = arith.constant 0 : index
    %c0_63 = arith.constant 0 : index
    %133 = vector.load %arg9[%c0_61, %c0_62, %c0_63] : memref<3x32x16xbf16, #tpu.memory_space<vmem>>, vector<1x32x16xbf16>
    %134 = vector.shape_cast %133 : vector<1x32x16xbf16> to vector<32x16xbf16>
    %cst_64 = arith.constant dense<0.000000e+00> : vector<96x16xf32>
    %135 = tpu.matmul %132, %134, %cst_64 {dimension_numbers = #tpu.dot_dimension_numbers<[1], [0], [0], [1], [0, 0, 1, 1], [], []>} : vector<96x32xbf16>, vector<32x16xbf16>, vector<96x16xf32> -> vector<96x16xf32>
    %136 = vector.shape_cast %126 : vector<12x8x32xbf16> to vector<96x32xbf16>
    %c1_65 = arith.constant 1 : index
    %c0_66 = arith.constant 0 : index
    %c0_67 = arith.constant 0 : index
    %137 = vector.load %arg9[%c1_65, %c0_66, %c0_67] : memref<3x32x16xbf16, #tpu.memory_space<vmem>>, vector<1x32x16xbf16>
    %138 = vector.shape_cast %137 : vector<1x32x16xbf16> to vector<32x16xbf16>
    %cst_68 = arith.constant dense<0.000000e+00> : vector<96x16xf32>
    %139 = tpu.matmul %136, %138, %cst_68 {dimension_numbers = #tpu.dot_dimension_numbers<[1], [0], [0], [1], [0, 0, 1, 1], [], []>} : vector<96x32xbf16>, vector<32x16xbf16>, vector<96x16xf32> -> vector<96x16xf32>
    %140 = arith.addf %135, %139 : vector<96x16xf32>
    %141 = vector.shape_cast %131 : vector<12x8x32xbf16> to vector<96x32xbf16>
    %c2_69 = arith.constant 2 : index
    %c0_70 = arith.constant 0 : index
    %c0_71 = arith.constant 0 : index
    %142 = vector.load %arg9[%c2_69, %c0_70, %c0_71] : memref<3x32x16xbf16, #tpu.memory_space<vmem>>, vector<1x32x16xbf16>
    %143 = vector.shape_cast %142 : vector<1x32x16xbf16> to vector<32x16xbf16>
    %cst_72 = arith.constant dense<0.000000e+00> : vector<96x16xf32>
    %144 = tpu.matmul %141, %143, %cst_72 {dimension_numbers = #tpu.dot_dimension_numbers<[1], [0], [0], [1], [0, 0, 1, 1], [], []>} : vector<96x32xbf16>, vector<32x16xbf16>, vector<96x16xf32> -> vector<96x16xf32>
    %145 = arith.addf %140, %144 : vector<96x16xf32>
    %c0_73 = arith.constant 0 : index
    %c0_74 = arith.constant 0 : index
    %146 = vector.load %arg10[%c0_73, %c0_74] : memref<1x16xf32, #tpu.memory_space<vmem>>, vector<1x16xf32>
    %147 = vector.broadcast %146 : vector<1x16xf32> to vector<96x16xf32>
    %148 = arith.addf %145, %147 : vector<96x16xf32>
    %cst_75 = arith.constant 0.000000e+00 : f32
    %149 = vector.broadcast %cst_75 : f32 to vector<96x16xf32>
    %150 = arith.maximumf %148, %149 : vector<96x16xf32>
    %151 = vector.shape_cast %150 : vector<96x16xf32> to vector<12x8x16xf32>
    %152 = vector.shape_cast %151 : vector<12x8x16xf32> to vector<6x2x8x16xf32>
    %153 = vector.extract_strided_slice %152 {offsets = [0, 0, 0, 0], sizes = [6, 1, 8, 16], strides = [1, 1, 1, 1]} : vector<6x2x8x16xf32> to vector<6x1x8x16xf32>
    %154 = vector.shape_cast %153 : vector<6x1x8x16xf32> to vector<6x8x16xf32>
    %155 = vector.extract_strided_slice %152 {offsets = [0, 1, 0, 0], sizes = [6, 1, 8, 16], strides = [1, 1, 1, 1]} : vector<6x2x8x16xf32> to vector<6x1x8x16xf32>
    %156 = vector.shape_cast %155 : vector<6x1x8x16xf32> to vector<6x8x16xf32>
    %157 = arith.maximumf %154, %156 : vector<6x8x16xf32>
    %158 = vector.extract_strided_slice %157 {offsets = [0, 0, 0], sizes = [1, 8, 16], strides = [1, 1, 1]} : vector<6x8x16xf32> to vector<1x8x16xf32>
    %159 = vector.shape_cast %158 : vector<1x8x16xf32> to vector<8x16xf32>
    %c0_76 = arith.constant 0 : index
    %c0_77 = arith.constant 0 : index
    %c0_78 = arith.constant 0 : index
    %160 = vector.load %arg11[%c0_76, %c0_77, %c0_78] : memref<6x16x128xf32, #tpu.memory_space<vmem>>, vector<1x16x128xf32>
    %161 = vector.shape_cast %160 : vector<1x16x128xf32> to vector<16x128xf32>
    %cst_79 = arith.constant dense<0.000000e+00> : vector<8x128xf32>
    %162 = tpu.matmul %159, %161, %cst_79 {dimension_numbers = #tpu.dot_dimension_numbers<[1], [0], [0], [1], [0, 0, 1, 1], [], []>} : vector<8x16xf32>, vector<16x128xf32>, vector<8x128xf32> -> vector<8x128xf32>
    %163 = vector.extract_strided_slice %157 {offsets = [1, 0, 0], sizes = [1, 8, 16], strides = [1, 1, 1]} : vector<6x8x16xf32> to vector<1x8x16xf32>
    %164 = vector.shape_cast %163 : vector<1x8x16xf32> to vector<8x16xf32>
    %c1_80 = arith.constant 1 : index
    %c0_81 = arith.constant 0 : index
    %c0_82 = arith.constant 0 : index
    %165 = vector.load %arg11[%c1_80, %c0_81, %c0_82] : memref<6x16x128xf32, #tpu.memory_space<vmem>>, vector<1x16x128xf32>
    %166 = vector.shape_cast %165 : vector<1x16x128xf32> to vector<16x128xf32>
    %cst_83 = arith.constant dense<0.000000e+00> : vector<8x128xf32>
    %167 = tpu.matmul %164, %166, %cst_83 {dimension_numbers = #tpu.dot_dimension_numbers<[1], [0], [0], [1], [0, 0, 1, 1], [], []>} : vector<8x16xf32>, vector<16x128xf32>, vector<8x128xf32> -> vector<8x128xf32>
    %168 = arith.addf %162, %167 : vector<8x128xf32>
    %169 = vector.extract_strided_slice %157 {offsets = [2, 0, 0], sizes = [1, 8, 16], strides = [1, 1, 1]} : vector<6x8x16xf32> to vector<1x8x16xf32>
    %170 = vector.shape_cast %169 : vector<1x8x16xf32> to vector<8x16xf32>
    %c2_84 = arith.constant 2 : index
    %c0_85 = arith.constant 0 : index
    %c0_86 = arith.constant 0 : index
    %171 = vector.load %arg11[%c2_84, %c0_85, %c0_86] : memref<6x16x128xf32, #tpu.memory_space<vmem>>, vector<1x16x128xf32>
    %172 = vector.shape_cast %171 : vector<1x16x128xf32> to vector<16x128xf32>
    %cst_87 = arith.constant dense<0.000000e+00> : vector<8x128xf32>
    %173 = tpu.matmul %170, %172, %cst_87 {dimension_numbers = #tpu.dot_dimension_numbers<[1], [0], [0], [1], [0, 0, 1, 1], [], []>} : vector<8x16xf32>, vector<16x128xf32>, vector<8x128xf32> -> vector<8x128xf32>
    %174 = arith.addf %168, %173 : vector<8x128xf32>
    %175 = vector.extract_strided_slice %157 {offsets = [3, 0, 0], sizes = [1, 8, 16], strides = [1, 1, 1]} : vector<6x8x16xf32> to vector<1x8x16xf32>
    %176 = vector.shape_cast %175 : vector<1x8x16xf32> to vector<8x16xf32>
    %c3 = arith.constant 3 : index
    %c0_88 = arith.constant 0 : index
    %c0_89 = arith.constant 0 : index
    %177 = vector.load %arg11[%c3, %c0_88, %c0_89] : memref<6x16x128xf32, #tpu.memory_space<vmem>>, vector<1x16x128xf32>
    %178 = vector.shape_cast %177 : vector<1x16x128xf32> to vector<16x128xf32>
    %cst_90 = arith.constant dense<0.000000e+00> : vector<8x128xf32>
    %179 = tpu.matmul %176, %178, %cst_90 {dimension_numbers = #tpu.dot_dimension_numbers<[1], [0], [0], [1], [0, 0, 1, 1], [], []>} : vector<8x16xf32>, vector<16x128xf32>, vector<8x128xf32> -> vector<8x128xf32>
    %180 = arith.addf %174, %179 : vector<8x128xf32>
    %181 = vector.extract_strided_slice %157 {offsets = [4, 0, 0], sizes = [1, 8, 16], strides = [1, 1, 1]} : vector<6x8x16xf32> to vector<1x8x16xf32>
    %182 = vector.shape_cast %181 : vector<1x8x16xf32> to vector<8x16xf32>
    %c4 = arith.constant 4 : index
    %c0_91 = arith.constant 0 : index
    %c0_92 = arith.constant 0 : index
    %183 = vector.load %arg11[%c4, %c0_91, %c0_92] : memref<6x16x128xf32, #tpu.memory_space<vmem>>, vector<1x16x128xf32>
    %184 = vector.shape_cast %183 : vector<1x16x128xf32> to vector<16x128xf32>
    %cst_93 = arith.constant dense<0.000000e+00> : vector<8x128xf32>
    %185 = tpu.matmul %182, %184, %cst_93 {dimension_numbers = #tpu.dot_dimension_numbers<[1], [0], [0], [1], [0, 0, 1, 1], [], []>} : vector<8x16xf32>, vector<16x128xf32>, vector<8x128xf32> -> vector<8x128xf32>
    %186 = arith.addf %180, %185 : vector<8x128xf32>
    %187 = vector.extract_strided_slice %157 {offsets = [5, 0, 0], sizes = [1, 8, 16], strides = [1, 1, 1]} : vector<6x8x16xf32> to vector<1x8x16xf32>
    %188 = vector.shape_cast %187 : vector<1x8x16xf32> to vector<8x16xf32>
    %c5 = arith.constant 5 : index
    %c0_94 = arith.constant 0 : index
    %c0_95 = arith.constant 0 : index
    %189 = vector.load %arg11[%c5, %c0_94, %c0_95] : memref<6x16x128xf32, #tpu.memory_space<vmem>>, vector<1x16x128xf32>
    %190 = vector.shape_cast %189 : vector<1x16x128xf32> to vector<16x128xf32>
    %cst_96 = arith.constant dense<0.000000e+00> : vector<8x128xf32>
    %191 = tpu.matmul %188, %190, %cst_96 {dimension_numbers = #tpu.dot_dimension_numbers<[1], [0], [0], [1], [0, 0, 1, 1], [], []>} : vector<8x16xf32>, vector<16x128xf32>, vector<8x128xf32> -> vector<8x128xf32>
    %192 = arith.addf %186, %191 : vector<8x128xf32>
    %c0_97 = arith.constant 0 : index
    %c0_98 = arith.constant 0 : index
    %193 = vector.load %arg12[%c0_97, %c0_98] : memref<8x128xf32, #tpu.memory_space<vmem>>, vector<8x128xf32>
    tpu.vector_store %arg12[%c0_97, %c0_98], %192 {strides = array<i32>} : memref<8x128xf32, #tpu.memory_space<vmem>>, vector<8x128xf32>,
    return
  }
  func.func @transform_0(%arg0: i32) -> (i32, i32) {
    %c0_i32 = arith.constant 0 : i32
    %c0_i32_0 = arith.constant 0 : i32
    return %arg0, %c0_i32 : i32, i32
  }
  func.func @transform_1(%arg0: i32) -> (i32, i32) {
    %c0_i32 = arith.constant 0 : i32
    %c0_i32_0 = arith.constant 0 : i32
    %c0_i32_1 = arith.constant 0 : i32
    return %c0_i32, %c0_i32_0 : i32, i32
  }
  func.func @transform_2(%arg0: i32) -> (i32, i32, i32) {
    %c0_i32 = arith.constant 0 : i32
    %c0_i32_0 = arith.constant 0 : i32
    %c0_i32_1 = arith.constant 0 : i32
    %c0_i32_2 = arith.constant 0 : i32
    return %c0_i32, %c0_i32_0, %c0_i32_1 : i32, i32, i32
  }
  func.func @transform_3(%arg0: i32) -> (i32, i32) {
    %c0_i32 = arith.constant 0 : i32
    %c0_i32_0 = arith.constant 0 : i32
    %c0_i32_1 = arith.constant 0 : i32
    return %c0_i32, %c0_i32_0 : i32, i32
  }
  func.func @transform_4(%arg0: i32) -> (i32, i32, i32) {
    %c0_i32 = arith.constant 0 : i32
    %c0_i32_0 = arith.constant 0 : i32
    %c0_i32_1 = arith.constant 0 : i32
    %c0_i32_2 = arith.constant 0 : i32
    return %c0_i32, %c0_i32_0, %c0_i32_1 : i32, i32, i32
  }
  func.func @transform_5(%arg0: i32) -> (i32, i32) {
    %c0_i32 = arith.constant 0 : i32
    %c0_i32_0 = arith.constant 0 : i32
    %c0_i32_1 = arith.constant 0 : i32
    return %c0_i32, %c0_i32_0 : i32, i32
  }
  func.func @transform_6(%arg0: i32) -> (i32, i32, i32) {
    %c0_i32 = arith.constant 0 : i32
    %c0_i32_0 = arith.constant 0 : i32
    %c0_i32_1 = arith.constant 0 : i32
    %c0_i32_2 = arith.constant 0 : i32
    return %c0_i32, %c0_i32_0, %c0_i32_1 : i32, i32, i32
  }
  func.func @transform_7(%arg0: i32) -> (i32, i32) {
    %c0_i32 = arith.constant 0 : i32
    %c0_i32_0 = arith.constant 0 : i32
    %c0_i32_1 = arith.constant 0 : i32
    return %c0_i32, %c0_i32_0 : i32, i32
  }
  func.func @transform_8(%arg0: i32) -> (i32, i32, i32) {
    %c0_i32 = arith.constant 0 : i32
    %c0_i32_0 = arith.constant 0 : i32
    %c0_i32_1 = arith.constant 0 : i32
    %c0_i32_2 = arith.constant 0 : i32
    return %c0_i32, %c0_i32_0, %c0_i32_1 : i32, i32, i32
  }
  func.func @transform_9(%arg0: i32) -> (i32, i32) {
    %c0_i32 = arith.constant 0 : i32
    %c0_i32_0 = arith.constant 0 : i32
    %c0_i32_1 = arith.constant 0 : i32
    return %c0_i32, %c0_i32_0 : i32, i32
  }
  func.func @transform_10(%arg0: i32) -> (i32, i32, i32) {
    %c0_i32 = arith.constant 0 : i32
    %c0_i32_0 = arith.constant 0 : i32
    %c0_i32_1 = arith.constant 0 : i32
    %c0_i32_2 = arith.constant 0 : i32
    return %c0_i32, %c0_i32_0, %c0_i32_1 : i32, i32, i32
  }
  func.func @transform_11(%arg0: i32) -> (i32, i32) {
    %c0_i32 = arith.constant 0 : i32
    %c0_i32_0 = arith.constant 0 : i32
    return %arg0, %c0_i32 : i32, i32
  }
}

</mosaic_0001>

<bundles_post_ra>
// kernel: tpu_custom_call.1
= control target key start
LH: loop header
LB: loop body
LE: loop exit
PB: predicated region body
PF: predicated region fallthrough
CT: control target
= control target key end

     0   :  { %16 = vsyncpa [#allocation3], 0  ;;  %s2573_s0 = inlined_call_operand.vmem [shape: s32[8,8], index: 0, kind: input, shape index: {}]   ;;  %s2574_s1 = inlined_call_operand.vmem [shape: bf16[50,32], index: 1, kind: input, shape index: {}]   ;;  %s2575_s2 = inlined_call_operand.vmem [shape: bf16[3,32,64], index: 2, kind: input, shape index: {}]   ;;  %s2576_s3 = inlined_call_operand.vmem [shape: f32[1,64], index: 3, kind: input, shape index: {}]   ;;  %s2577_s4 = inlined_call_operand.vmem [shape: bf16[3,64,32], index: 4, kind: input, shape index: {}]   ;;  %s2578_s5 = inlined_call_operand.vmem [shape: f32[1,32], index: 5, kind: input, shape index: {}]   ;;  %s2579_s6 = inlined_call_operand.hbm [shape: bf16[3,32,32], index: 6, kind: input, shape index: {}]   ;;  %s2580_s7 = inlined_call_operand.vmem [shape: f32[1,32], index: 7, kind: input, shape index: {}]   ;;  %s2581_s8 = inlined_call_operand.vmem [shape: bf16[3,32,16], index: 8, kind: input, shape index: {}]   ;;  %s2582_s9 = inlined_call_operand.vmem [shape: f32[1,16], index: 9, kind: input, shape index: {}]   ;;  %s2583_s10 = inlined_call_operand.vmem [shape: f32[6,16,128], index: 10, kind: input, shape index: {}]   ;;  %s2584_s11 = inlined_call_operand.hbm [shape: f32[8,128], index: 11, kind: output, shape index: {}]  }
   0x1   :  { %17 = vsyncpa [#allocation4], 0  ;;  %s34_s19 = sshll.u32 %s2579_s6, 4  ;;  %s2113_s20 = smov [#allocation2]   ;;  %s35_s19 = int_to_ptr.hbm [resolvable:$true] %s34_s19 }
   0x2   :  { %s36_s21 = sshll.u32 %s2113_s20, 4  ;;  %s2114_s22 = smov 64   ;;  %s37_s21 = int_to_ptr.vmem [resolvable:$true] %s36_s21 }
   0x3   :  { %s2115_s23 = smov 4  }
   0x4   :  { %42 = dma.hbm_to_vmem [thread:$0]  %s35_s19, 768, %s37_s21, [#allocation3], %s2114_s22, %s2114_s22, %s2115_s23  }
   0x5   :  { %2109 = dma.done.wait [#allocation3], 768  }
   0x6   :  { %2110 = vsyncadd [#allocation3], 4294966528  ;;  %v90_v0 = vlaneseq  ;;  %v56_v2 = vld [vmem:[%s2573_s0] sm:$0xff]  ;;  %v185_v12 = vld [vmem:[%s2574_s1 + $0x18] sm:$0x1]  ;;  %vm240_vm0 = vcmask 1040384  }
   0x7   :  { %57 = vxpose.xlu0.b32.start.end [1/1] (short) (narrow) %v56_v2, 8  ;;  %v219_v13 = vunpack.c.l.b16 %v185_v12  ;;  %v1951_v16 = vld [vmem:[%s2574_s1 + $0x10] sm:$0xff]  ;;  %v1950_v17 = vld [vmem:[%s2574_s1 + $0x8] sm:$0xff]  ;;  %v1949_v18 = vld [vmem:[%s2574_s1] sm:$0xff]  ;;  %v2116_v22 = vmov 0.0   ;;  %vm227_vm3 = vcmask 408576  }
   0x8   :  { %v91_v1 = vshrl.u32 %v90_v0, 7  ;;  %v146_v19 = vand.u32 127, %v90_v0  ;;  %v1953_v57 = vld [vmem:[%s2575_s2 + $0x8] sm:$0xff]  ;;  %v1952_v58 = vld [vmem:[%s2575_s2] sm:$0xff]  ;;  %v1955_v59 = vld [vmem:[%s2575_s2 + $0x18] sm:$0xff]  ;;  %v2117_v63 = vmov 0  }
   0x9   :  { %v223_v14 = vpack.c.b16 %v219_v13, %v219_v13  ;;  %415 = vmatpush.bf16.msra.mxu2 %v1953_v57  ;;  %2041 = vmatpush.bf16.msra.mxu3 %v1953_v57  ;;  %v1954_v60 = vld [vmem:[%s2575_s2 + $0x10] sm:$0xff]  ;;  %v2214_v0 = vunpack.c.l.b16 %v2117_v63  ;;  %vm326_vm10 = vcmask 261120   ;;  %vm612_vm11 = vcmask 523264  }
   0xa   :  { %2056 = vset.pattern.permute.xlu2 %v91_v1  ;;  %2055 = vset.pattern.permute.xlu1 %v91_v1  ;;  %vm1514_vm12 = vcmask 130048  }
   0xb   :  { %v242_v15 = vsel %vm240_vm0, %v223_v14, 0  ;;  %348 = vmatpush.bf16.msra.mxu1 %v1955_v59 }
   0xc   :  { %248 = vmatpush.bf16.msra.mxu0 %v242_v15  ;;  %v1957_v15 = vld [vmem:[%s2575_s2 + $0x28] sm:$0xff] }
   0xd   :  { %416 = vmatpush.bf16.msra.mxu2 %v1952_v58  ;;  %2042 = vmatpush.bf16.msra.mxu3 %v1952_v58 }
   0xf   :  { %349 = vmatpush.bf16.msra.mxu1 %v1954_v60 }
  0x10   :  { %249 = vmatpush.bf16.msra.mxu0 %v1951_v16 }
  0x11   :  { %473 = vmatpush.bf16.msrb.mxu3 %v1957_v15 }
  0x14   :  { %250 = vmatpush.bf16.msra.mxu0 %v1950_v17 }
  0x18   :  { %251 = vmatpush.bf16.msra.mxu0 %v1949_v18  ;;  %v1956_v18 = vld [vmem:[%s2575_s2 + $0x20] sm:$0xff] }
  0x19   :  { %474 = vmatpush.bf16.msrb.mxu3 %v1956_v18 }
  0x6e   :  { %2054 = vset.pattern.permute.xlu0 %v91_v1 }
  0xab   :  { %v73_v3 = vpop.trf.xlu0 }
  0xac   :  { %v110_v4 = vperm.slane %v73_v3, 3  ;;  %v96_v5 = vperm.slane %v73_v3, 1  ;;  %v89_v6 = vperm.slane %v73_v3, 0  ;;  %v117_v7 = vperm.slane %v73_v3, 4 }
  0xad   :  { %v103_v8 = vperm.slane %v73_v3, 2  ;;  %v131_v9 = vperm.slane %v73_v3, 6  ;;  %v124_v10 = vperm.slane %v73_v3, 5  ;;  %v138_v11 = vperm.slane %v73_v3, 7 }
  0xae   :  { %115 = vperm.xlu2 %2056, %v110_v4   ;;  %101 = vperm.xlu1 %2055, %v96_v5  }
  0xaf   :  { %94 = vperm.xlu0 %2054, %v89_v6  }
  0xb6   :  { %122 = vperm.xlu2 %2056, %v117_v7   ;;  %108 = vperm.xlu1 %2055, %v103_v8  }
  0xbe   :  { %136 = vperm.xlu2 %2056, %v131_v9   ;;  %129 = vperm.xlu1 %2055, %v124_v10  }
  0xc6   :  { %143 = vperm.xlu1 %2055, %v138_v11  }
 0x108   :  { %v116_v31 = vpop.permute.xlu2 %115 }
 0x109   :  { %vm150_vm5 = vcmp.eq.s32.totalorder %v116_v31, %v146_v19 }
 0x10a   :  { %v1690_v33 = vsel %vm150_vm5, 1.0, %v2116_v22 }
 0x10b   :  { %v174_v35 = vpack.c.bf16 %v1690_v33, %v1690_v33 }
 0x10d   :  { %v197_v37 = vunpack.c.l.b16 %v174_v35 }
 0x110   :  { %v123_v40 = vpop.permute.xlu2 %122 }
 0x111   :  { %vm151_vm7 = vcmp.eq.s32.totalorder %v123_v40, %v146_v19 }
 0x112   :  { %v1691_v42 = vsel %vm151_vm7, 1.0, %v2116_v22 }
 0x113   :  { %v175_v44 = vpack.c.bf16 %v1691_v42, %v1691_v42 }
 0x115   :  { %v198_v46 = vunpack.c.l.b16 %v175_v44  ;;  %v1961_v44 = vld [vmem:[%s2577_s4 + $0x18] sm:$0xff] }
 0x116   :  { %716 = vmatpush.bf16.msrb.mxu1 %v1961_v44 }
 0x118   :  { %v137_v49 = vpop.permute.xlu2 %136 }
 0x119   :  { %vm153_vm9 = vcmp.eq.s32.totalorder %v137_v49, %v146_v19  ;;  %v1964_v49 = vld [vmem:[%s2577_s4 + $0x30] sm:$0xff] }
 0x11a   :  { %v1693_v51 = vsel %vm153_vm9, 1.0, %v2116_v22 }
 0x11b   :  { %v177_v53 = vpack.c.bf16 %v1693_v51, %v1693_v51 }
 0x11d   :  { %v200_v55 = vunpack.c.l.b16 %v177_v53 }
 0x120   :  { %v102_v20 = vpop.permute.xlu1 %101 }
 0x121   :  { %vm148_vm1 = vcmp.eq.s32.totalorder %v102_v20, %v146_v19  ;;  %v95_v21 = vpop.permute.xlu0 %94 }
 0x122   :  { %v1688_v23 = vsel %vm148_vm1, 1.0, %v2116_v22  ;;  %vm147_vm2 = vcmp.eq.s32.totalorder %v95_v21, %v146_v19 }
 0x123   :  { %v172_v24 = vpack.c.bf16 %v1688_v23, %v1688_v23  ;;  %v1687_v25 = vsel %vm147_vm2, 1.0, %v2116_v22 }
 0x124   :  { %v171_v26 = vpack.c.bf16 %v1687_v25, %v1687_v25 }
 0x125   :  { %v195_v27 = vunpack.c.l.b16 %v172_v24 }
 0x126   :  { %v194_v28 = vunpack.c.l.b16 %v171_v26 }
 0x128   :  { %v109_v29 = vpop.permute.xlu1 %108  ;;  %v202_v30 = vpack.c.b16 %v195_v27, %v194_v28 }
 0x129   :  { %vm149_vm4 = vcmp.eq.s32.totalorder %v109_v29, %v146_v19 }
 0x12a   :  { %1707 = vmatmul.msk.bf16.vlgmr.msra.gmra.mxu0 %vm227_vm3, %v202_v30  ;;  %v1689_v32 = vsel %vm149_vm4, 1.0, %v2116_v22 }
 0x12b   :  { %v173_v34 = vpack.c.bf16 %v1689_v32, %v1689_v32 }
 0x12d   :  { %v196_v36 = vunpack.c.l.b16 %v173_v34  ;;  %v2118_v34 = vmov 0.0|0.0  }
 0x12e   :  { %v308_v35 = vunpack.c.l.b16 %v2118_v34 }
 0x12f   :  { %v203_v39 = vpack.c.b16 %v197_v37, %v196_v36 }
 0x130   :  { %v130_v38 = vpop.permute.xlu1 %129  ;;  %v313_v36 = vpack.c.b16 %v308_v35, %v308_v35 }
 0x131   :  { %vm152_vm6 = vcmp.eq.s32.totalorder %v130_v38, %v146_v19  ;;  %v2239_v38 = vpack.c.b16 %v2214_v0, %v2214_v0 }
 0x132   :  { %v1692_v41 = vsel %vm152_vm6, 1.0, %v2116_v22 }
 0x133   :  { %v176_v43 = vpack.c.bf16 %v1692_v41, %v1692_v41 }
 0x135   :  { %v199_v45 = vunpack.c.l.b16 %v176_v43 }
 0x137   :  { %v204_v48 = vpack.c.b16 %v199_v45, %v198_v46  ;;  %v1960_v45 = vld [vmem:[%s2577_s4 + $0x10] sm:$0xff] }
 0x138   :  { %v144_v47 = vpop.permute.xlu1 %143  ;;  %717 = vmatpush.bf16.msrb.mxu1 %v1960_v45 }
 0x139   :  { %vm154_vm8 = vcmp.eq.s32.totalorder %v144_v47, %v146_v19  ;;  %v1965_v47 = vld [vmem:[%s2577_s4 + $0x38] sm:$0xff] }
 0x13a   :  { %1708 = vmatmul.msk.bf16.gmra.mxu0 %vm227_vm3, %v203_v39  ;;  %v1694_v50 = vsel %vm154_vm8, 1.0, %v2116_v22  ;;  %2043 = vmatpush.bf16.msrb.mxu2 %v1965_v47 }
 0x13b   :  { %v178_v52 = vpack.c.bf16 %v1694_v50, %v1694_v50  ;;  %635 = vmatpush.bf16.msrb.mxu0 %v1965_v47  ;;  %v1958_v50 = vld [vmem:[%s2577_s4] sm:$0xff] }
 0x13d   :  { %v201_v54 = vunpack.c.l.b16 %v178_v52  ;;  %v1963_v52 = vld [vmem:[%s2577_s4 + $0x28] sm:$0xff] }
 0x13e   :  { %2044 = vmatpush.bf16.msrb.mxu2 %v1964_v49 }
 0x13f   :  { %v205_v56 = vpack.c.b16 %v201_v54, %v200_v55  ;;  %636 = vmatpush.bf16.msrb.mxu0 %v1964_v49  ;;  %v1962_v55 = vld [vmem:[%s2577_s4 + $0x20] sm:$0xff] }
 0x142   :  { %2045 = vmatpush.bf16.msrb.mxu2 %v1963_v52 }
 0x143   :  { %637 = vmatpush.bf16.msrb.mxu0 %v1963_v52 }
 0x146   :  { %2046 = vmatpush.bf16.msrb.mxu2 %v1962_v55 }
 0x147   :  { %638 = vmatpush.bf16.msrb.mxu0 %v1962_v55 }
 0x14a   :  { %1709 = vmatmul.msk.bf16.gmra.mxu0 %vm227_vm3, %v204_v48  ;;  %v1959_v48 = vld [vmem:[%s2577_s4 + $0x8] sm:$0xff] }
 0x14b   :  { %718 = vmatpush.bf16.msrb.mxu1 %v1959_v48 }
 0x14f   :  { %719 = vmatpush.bf16.msrb.mxu1 %v1958_v50 }
 0x15a   :  { %1710 = vmatmul.msk.bf16.gmra.mxu0 %vm227_vm3, %v205_v56 }
 0x1a7   :  { %v253_v61 = vpop.f32.mrf.mxu0 }
 0x1a8   :  { %v273_v62 = vpack.c.bf16 %v253_v61, %v253_v61  ;;  %v2282_v61 = vld [vmem:[%s2576_s3] ss:$0 sm:$0xff] }
 0x1aa   :  { %v300_v1 = vunpack.c.l.b16 %v273_v62 }
 0x1ac   :  { %v377_v2 = vpack.c.b16 %v300_v1, %v2214_v0 }
 0x1ae   :  { %1736 = vmatmul.msk.bf16.vlgmr.msra.gmra.mxu2 %vm326_vm10, %v377_v2 }
 0x1af   :  { %v255_v3 = vpop.f32.mrf.mxu0 }
 0x1b0   :  { %v274_v4 = vpack.c.bf16 %v255_v3, %v255_v3 }
 0x1b2   :  { %v301_v5 = vunpack.c.l.b16 %v274_v4 }
 0x1b4   :  { %v309_v6 = vpack.c.b16 %v301_v5, %v300_v1 }
 0x1b6   :  { %1723 = vmatmul.msk.bf16.vlgmr.msra.gmra.mxu1 %vm326_vm10, %v309_v6 }
 0x1b7   :  { %v258_v7 = vpop.f32.mrf.mxu0 }
 0x1b8   :  { %v275_v8 = vpack.c.bf16 %v258_v7, %v258_v7 }
 0x1ba   :  { %v302_v9 = vunpack.c.l.b16 %v275_v8 }
 0x1bc   :  { %v378_v10 = vpack.c.b16 %v302_v9, %v301_v5 }
 0x1be   :  { %1737 = vmatmul.msk.bf16.gmra.mxu2 %vm326_vm10, %v378_v10 }
 0x1bf   :  { %v260_v11 = vpop.f32.mrf.mxu0 }
 0x1c0   :  { %v276_v12 = vpack.c.bf16 %v260_v11, %v260_v11 }
 0x1c2   :  { %v303_v13 = vunpack.c.l.b16 %v276_v12 }
 0x1c4   :  { %v310_v14 = vpack.c.b16 %v303_v13, %v302_v9 }
 0x1c6   :  { %1724 = vmatmul.msk.bf16.gmra.mxu1 %vm326_vm10, %v310_v14 }
 0x1c7   :  { %v263_v16 = vpop.f32.mrf.mxu0 }
 0x1c8   :  { %v277_v17 = vpack.c.bf16 %v263_v16, %v263_v16 }
 0x1ca   :  { %v304_v19 = vunpack.c.l.b16 %v277_v17 }
 0x1cc   :  { %v379_v20 = vpack.c.b16 %v304_v19, %v303_v13 }
 0x1ce   :  { %1738 = vmatmul.msk.bf16.gmra.mxu2 %vm326_vm10, %v379_v20 }
 0x1cf   :  { %v265_v21 = vpop.f32.mrf.mxu0 }
 0x1d0   :  { %v278_v22 = vpack.c.bf16 %v265_v21, %v265_v21 }
 0x1d2   :  { %v305_v23 = vunpack.c.l.b16 %v278_v22 }
 0x1d4   :  { %v311_v24 = vpack.c.b16 %v305_v23, %v304_v19 }
 0x1d6   :  { %1725 = vmatmul.msk.bf16.gmra.mxu1 %vm326_vm10, %v311_v24 }
 0x1d7   :  { %v268_v25 = vpop.f32.mrf.mxu0 }
 0x1d8   :  { %v279_v26 = vpack.c.bf16 %v268_v25, %v268_v25 }
 0x1da   :  { %v306_v27 = vunpack.c.l.b16 %v279_v26 }
 0x1dc   :  { %v380_v28 = vpack.c.b16 %v306_v27, %v305_v23 }
 0x1de   :  { %1739 = vmatmul.msk.bf16.gmra.mxu2 %vm326_vm10, %v380_v28 }
 0x1df   :  { %v270_v29 = vpop.f32.mrf.mxu0 }
 0x1e0   :  { %v280_v30 = vpack.c.bf16 %v270_v29, %v270_v29 }
 0x1e2   :  { %v307_v31 = vunpack.c.l.b16 %v280_v30 }
 0x1e4   :  { %v312_v32 = vpack.c.b16 %v307_v31, %v306_v27  ;;  %v381_v33 = vpack.c.b16 %v307_v31, %v307_v31  ;;  %v447_v37 = vpack.c.b16 %v308_v35, %v307_v31 }
 0x1e6   :  { %1726 = vmatmul.msk.bf16.gmra.mxu1 %vm326_vm10, %v312_v32  ;;  %1740 = vmatmul.msk.bf16.vlgmr.msra.gmra.mxu3 %vm326_vm10, %v381_v33 }
 0x1f6   :  { %1727 = vmatmul.msk.bf16.gmra.mxu1 %vm326_vm10, %v313_v36  ;;  %1753 = vmatmul.msk.bf16.vlgmr.msrb.gmra.mxu3 %vm326_vm10, %v378_v10 }
 0x206   :  { %1754 = vmatmul.msk.bf16.gmra.mxu3 %vm326_vm10, %v379_v20 }
 0x216   :  { %1755 = vmatmul.msk.bf16.gmra.mxu3 %vm326_vm10, %v380_v28 }
 0x226   :  { %1756 = vmatmul.msk.bf16.gmra.mxu3 %vm326_vm10, %v447_v37 }
 0x231   :  { %v418_v53 = vpop.f32.mrf.mxu2 }
 0x233   :  { %v351_v39 = vpop.f32.mrf.mxu1 }
 0x234   :  { %v419_v60 = vadd.f32 %v418_v53, %v351_v39 }
 0x236   :  { %1757 = vmatmul.msk.bf16.gmra.mxu3 %vm326_vm10, %v2239_v38 }
 0x239   :  { %v420_v58 = vpop.f32.mrf.mxu2 }
 0x23b   :  { %v353_v40 = vpop.f32.mrf.mxu1 }
 0x23c   :  { %v421_v5 = vadd.f32 %v420_v58, %v353_v40 }
 0x241   :  { %v423_v3 = vpop.f32.mrf.mxu2 }
 0x243   :  { %v356_v41 = vpop.f32.mrf.mxu1 }
 0x244   :  { %v424_v14 = vadd.f32 %v423_v3, %v356_v41 }
 0x249   :  { %v425_v13 = vpop.f32.mrf.mxu2 }
 0x24b   :  { %v358_v42 = vpop.f32.mrf.mxu1 }
 0x24c   :  { %v426_v22 = vadd.f32 %v425_v13, %v358_v42 }
 0x251   :  { %v428_v24 = vpop.f32.mrf.mxu2 }
 0x253   :  { %v2243_v43 = vpop.f32.mrf.mxu1 }
 0x254   :  { %v429_v31 = vadd.f32 %v428_v24, %v2243_v43  ;;  %v1969_v43 = vld [vmem:[%s2577_s4 + $0x58] sm:$0xff] }
 0x255   :  { %788 = vmatpush.bf16.msra.mxu2 %v1969_v43 }
 0x259   :  { %v430_v36 = vpop.f32.mrf.mxu2 }
 0x25b   :  { %v2251_v46 = vpop.f32.mrf.mxu1 }
 0x25c   :  { %v431_v41 = vadd.f32 %v430_v36, %v2251_v46  ;;  %v1968_v46 = vld [vmem:[%s2577_s4 + $0x50] sm:$0xff] }
 0x25d   :  { %789 = vmatpush.bf16.msra.mxu2 %v1968_v46 }
 0x261   :  { %v433_v50 = vpop.f32.mrf.mxu2 }
 0x263   :  { %v2265_v51 = vpop.f32.mrf.mxu1 }
 0x264   :  { %v434_v53 = vadd.f32 %v433_v50, %v2265_v51 }
 0x269   :  { %v2270_v54 = vpop.f32.mrf.mxu3  ;;  %v435_v3 = vpop.f32.mrf.mxu2 }
 0x26b   :  { %v2275_v56 = vpop.f32.mrf.mxu1 }
 0x271   :  { %v440_v57 = vpop.f32.mrf.mxu3 }
 0x273   :  { %v2277_v59 = vpop.f32.mrf.mxu1 }
 0x279   :  { %v476_v62 = vpop.f32.mrf.mxu3 }
 0x27a   :  { %v500_v63 = vadd.f32 %v476_v62, %v419_v60 }
 0x27b   :  { %v373_v1 = vpop.f32.mrf.mxu1 }
 0x27c   :  { %v513_v2 = vadd.f32 %v2282_v61, %v500_v63 }
 0x27e   :  { %v522_v4 = vmax.f32 %v513_v2, 0.0  ;;  %v1967_v2 = vld [vmem:[%s2577_s4 + $0x48] sm:$0xff] }
 0x27f   :  { %790 = vmatpush.bf16.msra.mxu2 %v1967_v2 }
 0x280   :  { %v535_v6 = vpack.c.bf16 %v522_v4, %v522_v4  ;;  %v436_v4 = vadd.f32 %v435_v3, %v2275_v56  ;;  %v2327_v56 = vld [vmem:[%s2576_s3] sm:$0x1] }
 0x281   :  { %v478_v7 = vpop.f32.mrf.mxu3 }
 0x282   :  { %v572_v8 = vunpack.c.l.b16 %v535_v6  ;;  %v501_v9 = vadd.f32 %v478_v7, %v421_v5 }
 0x284   :  { %v668_v10 = vpack.c.b16 %v572_v8, %v2214_v0  ;;  %v514_v11 = vadd.f32 %v2282_v61, %v501_v9 }
 0x286   :  { %v523_v12 = vmax.f32 %v514_v11, 0.0  ;;  %1804 = vmatmul.msk.bf16.vlgmr.msrb.gmra.mxu1 %vm612_vm11, %v668_v10  ;;  %v439_v11 = vadd.f32 %v2270_v54, %v2277_v59  ;;  %v1966_v54 = vld [vmem:[%s2577_s4 + $0x40] sm:$0xff] }
 0x287   :  { %791 = vmatpush.bf16.msra.mxu2 %v1966_v54 }
 0x288   :  { %v536_v15 = vpack.c.bf16 %v523_v12, %v523_v12 }
 0x289   :  { %v481_v16 = vpop.f32.mrf.mxu3 }
 0x28a   :  { %v573_v17 = vunpack.c.l.b16 %v536_v15  ;;  %v502_v18 = vadd.f32 %v481_v16, %v424_v14 }
 0x28c   :  { %v582_v19 = vpack.c.b16 %v573_v17, %v572_v8  ;;  %v515_v20 = vadd.f32 %v2282_v61, %v502_v18  ;;  %v531_v18 = vmax.f32 %v2327_v56, 0.0 }
 0x28e   :  { %v524_v21 = vmax.f32 %v515_v20, 0.0  ;;  %1782 = vmatmul.msk.bf16.vlgmr.msrb.gmra.mxu0 %vm612_vm11, %v582_v19  ;;  %v533_v20 = vperm.slane %v531_v18, 0 }
 0x290   :  { %v537_v23 = vpack.c.bf16 %v524_v21, %v524_v21  ;;  %v544_v24 = vpack.c.bf16 %v533_v20, %v533_v20 }
 0x291   :  { %v483_v25 = vpop.f32.mrf.mxu3 }
 0x292   :  { %v574_v26 = vunpack.c.l.b16 %v537_v23  ;;  %v503_v27 = vadd.f32 %v483_v25, %v426_v22 }
 0x294   :  { %v516_v28 = vadd.f32 %v2282_v61, %v503_v27  ;;  %v2291_v29 = vpack.c.b16 %v574_v26, %v573_v17  ;;  %v2036_v27 = vld [vmem:[%s2577_s4 + $0x38] sm:$0xff]  }
 0x296   :  { %v525_v30 = vmax.f32 %v516_v28, 0.0  ;;  %1805 = vmatmul.msk.bf16.gmra.mxu1 %vm612_vm11, %v2291_v29  ;;  %v2040_v28 = vld [vmem:[%s2577_s4 + $0x58] sm:$0xff]  }
 0x298   :  { %v538_v32 = vpack.c.bf16 %v525_v30, %v525_v30 }
 0x299   :  { %v486_v33 = vpop.f32.mrf.mxu3 }
 0x29a   :  { %v575_v34 = vunpack.c.l.b16 %v538_v32  ;;  %v504_v35 = vadd.f32 %v486_v33, %v429_v31  ;;  %v2013_v31 = vunpack.c.h.bf16 %v2036_v27  ;;  %v2029_v32 = vunpack.c.h.bf16 %v2040_v28 }
 0x29c   :  { %v517_v37 = vadd.f32 %v2282_v61, %v504_v35  ;;  %v583_v39 = vpack.c.b16 %v575_v34, %v574_v26  ;;  %v2032_v26 = vld [vmem:[%s2577_s4 + $0x18] sm:$0xff]   ;;  %v2028_v35 = vunpack.c.l.bf16 %v2040_v28 }
 0x29d   :  { %v1997_v30 = vunpack.c.h.bf16 %v2032_v26  ;;  %v1996_v33 = vunpack.c.l.bf16 %v2032_v26  ;;  %v1975_v26 = vld [vmem:[#allocation2 + $0x28] sm:$0xff] }
 0x29e   :  { %v526_v40 = vmax.f32 %v517_v37, 0.0  ;;  %1783 = vmatmul.msk.bf16.gmra.mxu0 %vm612_vm11, %v583_v39  ;;  %1135 = vmatpush.bf16.msra.mxu1 %v1975_v26 }
 0x29f   :  { %v910_v36 = vadd.f32 %v2013_v31, %v1997_v30 }
 0x2a0   :  { %v539_v42 = vpack.c.bf16 %v526_v40, %v526_v40 }
 0x2a1   :  { %v488_v44 = vpop.f32.mrf.mxu3  ;;  %v918_v39 = vadd.f32 %v2029_v32, %v910_v36 }
 0x2a2   :  { %v576_v45 = vunpack.c.l.b16 %v539_v42  ;;  %v505_v47 = vadd.f32 %v488_v44, %v431_v41  ;;  %v2031_v42 = vld [vmem:[%s2577_s4 + $0x10] sm:$0xff]  }
 0x2a3   :  { %929 = vmatpush.msra.mxu3 %v918_v39  ;;  %v2035_v44 = vld [vmem:[%s2577_s4 + $0x30] sm:$0xff]   ;;  %v1992_v46 = vunpack.c.l.bf16 %v2031_v42 }
 0x2a4   :  { %v518_v48 = vadd.f32 %v2282_v61, %v505_v47  ;;  %v2303_v49 = vpack.c.b16 %v576_v45, %v575_v34  ;;  %v2012_v34 = vunpack.c.l.bf16 %v2036_v27  ;;  %v1993_v47 = vunpack.c.h.bf16 %v2031_v42 }
 0x2a5   :  { %v2009_v43 = vunpack.c.h.bf16 %v2035_v44 }
 0x2a6   :  { %v527_v52 = vmax.f32 %v518_v48, 0.0  ;;  %1806 = vmatmul.msk.bf16.gmra.mxu1 %vm612_vm11, %v2303_v49  ;;  %v909_v37 = vadd.f32 %v2012_v34, %v1996_v33 }
 0x2a7   :  { %v908_v50 = vadd.f32 %v2009_v43, %v1993_v47  ;;  %v1972_v43 = vld [vmem:[#allocation2 + $0x10] sm:$0xff] }
 0x2a8   :  { %v540_v55 = vpack.c.bf16 %v527_v52, %v527_v52  ;;  %v917_v41 = vadd.f32 %v2028_v35, %v909_v37  ;;  %v1971_v37 = vld [vmem:[#allocation2 + $0x8] sm:$0xff] }
 0x2a9   :  { %v491_v57 = vpop.f32.mrf.mxu3  ;;  %1075 = vmatpush.bf16.msra.mxu0 %v1971_v37 }
 0x2aa   :  { %v577_v58 = vunpack.c.l.b16 %v540_v55  ;;  %v506_v60 = vadd.f32 %v491_v57, %v434_v53  ;;  %930 = vmatpush.msra.mxu3 %v917_v41  ;;  %v2008_v53 = vunpack.c.l.bf16 %v2035_v44  ;;  %v1974_v41 = vld [vmem:[#allocation2 + $0x20] sm:$0xff] }
 0x2ab   :  { %1136 = vmatpush.bf16.msra.mxu1 %v1974_v41 }
 0x2ac   :  { %v519_v62 = vadd.f32 %v2282_v61, %v506_v60  ;;  %v584_v63 = vpack.c.b16 %v577_v58, %v576_v45  ;;  %v2039_v45 = vld [vmem:[%s2577_s4 + $0x50] sm:$0xff]   ;;  %v907_v57 = vadd.f32 %v2008_v53, %v1992_v46  ;;  %v2030_v60 = vld [vmem:[%s2577_s4 + $0x8] sm:$0xff]  }
 0x2ad   :  { %v2025_v48 = vunpack.c.h.bf16 %v2039_v45  ;;  %v2024_v55 = vunpack.c.l.bf16 %v2039_v45  ;;  %v1973_v45 = vld [vmem:[#allocation2 + $0x18] sm:$0xff] }
 0x2ae   :  { %v528_v1 = vmax.f32 %v519_v62, 0.0  ;;  %1784 = vmatmul.msk.bf16.gmra.mxu0 %vm612_vm11, %v584_v63  ;;  %v2034_v62 = vld [vmem:[%s2577_s4 + $0x28] sm:$0xff]  }
 0x2af   :  { %v916_v52 = vadd.f32 %v2025_v48, %v908_v50  ;;  %v2038_v63 = vld [vmem:[%s2577_s4 + $0x48] sm:$0xff]  }
 0x2b0   :  { %v541_v5 = vpack.c.bf16 %v528_v1, %v528_v1  ;;  %v1989_v1 = vunpack.c.h.bf16 %v2030_v60  ;;  %v2021_v2 = vunpack.c.h.bf16 %v2038_v63 }
 0x2b1   :  { %v493_v51 = vpop.f32.mrf.mxu3  ;;  %931 = vmatpush.msra.mxu3 %v916_v52  ;;  %v2413_v52 = vld [vmem:[%s2578_s5] ss:$0 sm:$0xff] }
 0x2b2   :  { %v578_v6 = vunpack.c.l.b16 %v541_v5  ;;  %v507_v7 = vadd.f32 %v493_v51, %v436_v4  ;;  %v1988_v5 = vunpack.c.l.bf16 %v2030_v60  ;;  %v2004_v51 = vunpack.c.l.bf16 %v2034_v62 }
 0x2b4   :  { %v520_v8 = vadd.f32 %v2282_v61, %v507_v7  ;;  %v2318_v9 = vpack.c.b16 %v578_v6, %v577_v58  ;;  %v915_v58 = vadd.f32 %v2024_v55, %v907_v57  ;;  %v905_v7 = vadd.f32 %v2004_v51, %v1988_v5 }
 0x2b6   :  { %v529_v10 = vmax.f32 %v520_v8, 0.0  ;;  %1807 = vmatmul.msk.bf16.gmra.mxu1 %vm612_vm11, %v2318_v9  ;;  %932 = vmatpush.msra.mxu3 %v915_v58 }
 0x2b8   :  { %v542_v12 = vpack.c.bf16 %v529_v10, %v529_v10 }
 0x2b9   :  { %v496_v13 = vpop.f32.mrf.mxu3 }
 0x2ba   :  { %v579_v14 = vunpack.c.l.b16 %v542_v12  ;;  %v508_v15 = vadd.f32 %v496_v13, %v439_v11  ;;  %v1983_v12 = vld [vmem:[%s2577_s4] sm:$0xff]  }
 0x2bb   :  { %v2033_v13 = vld [vmem:[%s2577_s4 + $0x20] sm:$0xff]   ;;  %v1984_v54 = vunpack.c.l.bf16 %v1983_v12 }
 0x2bc   :  { %v585_v16 = vpack.c.b16 %v579_v14, %v578_v6  ;;  %v521_v17 = vadd.f32 %v2282_v61, %v508_v15  ;;  %v581_v61 = vunpack.c.l.b16 %v544_v24  ;;  %v2020_v6 = vunpack.c.l.bf16 %v2038_v63 }
 0x2bd   :  { %v2001_v15 = vunpack.c.h.bf16 %v2033_v13 }
 0x2be   :  { %v530_v19 = vmax.f32 %v521_v17, 0.0  ;;  %1785 = vmatmul.msk.bf16.vlgmr.msrb.gmra.mxu2 %vm612_vm11, %v585_v16  ;;  %v587_v40 = vpack.c.b16 %v581_v61, %v581_v61  ;;  %v913_v8 = vadd.f32 %v2020_v6, %v905_v7 }
 0x2c0   :  { %v543_v59 = vpack.c.bf16 %v530_v19, %v530_v19 }
 0x2c1   :  { %v498_v21 = vpop.f32.mrf.mxu3 }
 0x2c2   :  { %v580_v22 = vunpack.c.l.b16 %v543_v59  ;;  %v2000_v59 = vunpack.c.l.bf16 %v2033_v13 }
 0x2c4   :  { %v2337_v23 = vpack.c.b16 %v580_v22, %v579_v14  ;;  %v586_v25 = vpack.c.b16 %v581_v61, %v580_v22  ;;  %v1985_v14 = vunpack.c.h.bf16 %v1983_v12  ;;  %v903_v22 = vadd.f32 %v2000_v59, %v1984_v54 }
 0x2c6   :  { %1808 = vmatmul.msk.bf16.gmra.mxu1 %vm612_vm11, %v2337_v23  ;;  %v904_v17 = vadd.f32 %v2001_v15, %v1985_v14 }
 0x2ce   :  { %1786 = vmatmul.msk.bf16.gmra.mxu2 %vm612_vm11, %v586_v25 }
 0x2d6   :  { %1809 = vmatmul.msk.bf16.gmra.mxu1 %vm612_vm11, %v587_v40 }
 0x2de   :  { %1787 = vmatmul.msk.bf16.gmra.mxu2 %vm612_vm11, %v587_v40 }
 0x2ee   :  { %1834 = vmatmul.msk.bf16.vlgmr.msra.gmra.mxu2 %vm612_vm11, %v2291_v29  ;;  %v2005_v29 = vunpack.c.h.bf16 %v2034_v62 }
 0x2f0   :  { %v906_v3 = vadd.f32 %v2005_v29, %v1989_v1 }
 0x2f2   :  { %v914_v4 = vadd.f32 %v2021_v2, %v906_v3 }
 0x2f4   :  { %933 = vmatpush.msra.mxu3 %v914_v4 }
 0x2f6   :  { %934 = vmatpush.msra.mxu3 %v913_v8 }
 0x2fe   :  { %1835 = vmatmul.msk.bf16.gmra.mxu2 %vm612_vm11, %v2303_v49  ;;  %v2037_v49 = vld [vmem:[%s2577_s4 + $0x40] sm:$0xff]  }
 0x2ff   :  { %v2017_v16 = vunpack.c.h.bf16 %v2037_v49  ;;  %v2016_v21 = vunpack.c.l.bf16 %v2037_v49 }
 0x301   :  { %v912_v19 = vadd.f32 %v2017_v16, %v904_v17  ;;  %v911_v24 = vadd.f32 %v2016_v21, %v903_v22 }
 0x303   :  { %v721_v10 = vpop.f32.mrf.mxu1  ;;  %935 = vmatpush.msra.mxu3 %v912_v19 }
 0x305   :  { %936 = vmatpush.msra.mxu3 %v911_v24 }
 0x306   :  { %1840 = vmatmul.msk.f32.vlgmr.msra.gmra.mxu3 %vm612_vm11, %v531_v18 }
 0x307   :  { %1012 = vmatpush.bf16.msrb.mxu3 %v1973_v45 }
 0x30b   :  { %v723_v11 = vpop.f32.mrf.mxu1  ;;  %1013 = vmatpush.bf16.msrb.mxu3 %v1972_v43 }
 0x30e   :  { %1836 = vmatmul.msk.bf16.gmra.mxu2 %vm612_vm11, %v2318_v9 }
 0x313   :  { %v726_v20 = vpop.f32.mrf.mxu1 }
 0x31b   :  { %v728_v61 = vpop.f32.mrf.mxu1 }
 0x31e   :  { %1837 = vmatmul.msk.bf16.gmra.mxu2 %vm612_vm11, %v2337_v23 }
 0x323   :  { %v2391_v25 = vpop.f32.mrf.mxu1 }
 0x32b   :  { %v2393_v9 = vpop.f32.mrf.mxu1 }
 0x32e   :  { %1838 = vmatmul.msk.bf16.gmra.mxu2 %vm612_vm11, %v587_v40  ;;  %v640_v40 = vpop.f32.mrf.mxu0 }
 0x32f   :  { %v722_v48 = vadd.f32 %v721_v10, %v640_v40 }
 0x333   :  { %v736_v27 = vpop.f32.mrf.mxu1 }
 0x336   :  { %v642_v44 = vpop.f32.mrf.mxu0 }
 0x337   :  { %v724_v53 = vadd.f32 %v723_v11, %v642_v44 }
 0x33b   :  { %v2396_v28 = vpop.f32.mrf.mxu1 }
 0x33e   :  { %1839 = vmatmul.msk.bf16.gmra.mxu2 %vm612_vm11, %v2239_v38  ;;  %v1970_v38 = vld [vmem:[#allocation2] sm:$0xff]  ;;  %v645_v46 = vpop.f32.mrf.mxu0 }
 0x33f   :  { %1076 = vmatpush.bf16.msra.mxu0 %v1970_v38  ;;  %v727_v4 = vadd.f32 %v726_v20, %v645_v46 }
 0x341   :  { %v655_v56 = vpop.f32.mrf.mxu2 }
 0x342   :  { %v2400_v18 = vadd.f32 %v736_v27, %v655_v56 }
 0x343   :  { %v741_v30 = vpop.f32.mrf.mxu1 }
 0x346   :  { %v647_v29 = vpop.f32.mrf.mxu0 }
 0x347   :  { %v729_v7 = vadd.f32 %v728_v61, %v647_v29 }
 0x349   :  { %v2402_v31 = vpop.f32.mrf.mxu2 }
 0x34b   :  { %v2404_v23 = vpop.f32.mrf.mxu1 }
 0x34e   :  { %v650_v12 = vpop.f32.mrf.mxu0 }
 0x34f   :  { %v732_v19 = vadd.f32 %v2391_v25, %v650_v12  ;;  %v1978_v12 = vld [vmem:[%s2581_s8 + $0x10] sm:$0xff] }
 0x351   :  { %v660_v32 = vpop.f32.mrf.mxu2 }
 0x352   :  { %v2406_v33 = vadd.f32 %v741_v30, %v660_v32 }
 0x353   :  { %v746_v34 = vpop.f32.mrf.mxu1 }
 0x356   :  { %v652_v59 = vpop.f32.mrf.mxu0 }
 0x357   :  { %v734_v22 = vadd.f32 %v2393_v9, %v652_v59  ;;  %v739_v9 = vadd.f32 %v2396_v28, %v2402_v31 }
 0x359   :  { %v2408_v35 = vpop.f32.mrf.mxu2 }
 0x35b   :  { %v747_v36 = vpop.f32.mrf.mxu1 }
 0x361   :  { %v665_v39 = vpop.f32.mrf.mxu2 }
 0x369   :  { %v666_v42 = vpop.f32.mrf.mxu2 }
 0x371   :  { %v793_v47 = vpop.f32.mrf.mxu2 }
 0x372   :  { %v821_v50 = vadd.f32 %v793_v47, %v722_v48 }
 0x374   :  { %v835_v57 = vadd.f32 %v2413_v52, %v821_v50 }
 0x376   :  { %v845_v62 = vmax.f32 %v835_v57, 0.0 }
 0x379   :  { %v795_v55 = vpop.f32.mrf.mxu2 }
 0x37a   :  { %v822_v58 = vadd.f32 %v795_v55, %v724_v53 }
 0x37c   :  { %v836_v60 = vadd.f32 %v2413_v52, %v822_v58  ;;  %v744_v58 = vadd.f32 %v2404_v23, %v2408_v35  ;;  %v1979_v23 = vld [vmem:[%s2581_s8 + $0x18] sm:$0xff]  ;;  %v1977_v35 = vld [vmem:[%s2581_s8 + $0x8] sm:$0xff] }
 0x37d   :  { %1295 = vmatpush.bf16.msrb.mxu2 %v1979_v23  ;;  %1370 = vmatpush.bf16.msra.mxu3 %v1977_v35 }
 0x37e   :  { %v846_v63 = vmax.f32 %v836_v60, 0.0 }
 0x380   :  { %v946_v1 = vmax.f32 %v845_v62, %v846_v63 }
 0x381   :  { %v798_v2 = vpop.f32.mrf.mxu2  ;;  %1296 = vmatpush.bf16.msrb.mxu2 %v1978_v12 }
 0x382   :  { %v951_v3 = vpack.c.bf16 %v946_v1, %v946_v1  ;;  %v823_v6 = vadd.f32 %v798_v2, %v727_v4 }
 0x384   :  { %v972_v5 = vunpack.c.l.b16 %v951_v3  ;;  %v837_v10 = vadd.f32 %v2413_v52, %v823_v6 }
 0x386   :  { %v1045_v51 = vpack.c.b16 %v972_v5, %v2214_v0  ;;  %v847_v49 = vmax.f32 %v837_v10, 0.0 }
 0x388   :  { %1863 = vmatmul.msk.bf16.vlgmr.msra.gmra.mxu0 %vm326_vm10, %v1045_v51 }
 0x389   :  { %v800_v8 = vpop.f32.mrf.mxu2  ;;  %v938_v47 = vpop.f32.mrf.mxu3 }
 0x38a   :  { %v824_v11 = vadd.f32 %v800_v8, %v729_v7 }
 0x38c   :  { %v838_v13 = vadd.f32 %v2413_v52, %v824_v11 }
 0x38e   :  { %v848_v14 = vmax.f32 %v838_v13, 0.0  ;;  %v1976_v13 = vld [vmem:[%s2581_s8] sm:$0xff] }
 0x38f   :  { %1371 = vmatpush.bf16.msra.mxu3 %v1976_v13 }
 0x390   :  { %v947_v15 = vmax.f32 %v847_v49, %v848_v14  ;;  %v1980_v49 = vld [vmem:[%s2581_s8 + $0x20] sm:$0xff] }
 0x391   :  { %v803_v16 = vpop.f32.mrf.mxu2 }
 0x392   :  { %v952_v17 = vpack.c.bf16 %v947_v15, %v947_v15  ;;  %v825_v21 = vadd.f32 %v803_v16, %v732_v19  ;;  %v2477_v19 = vld [vmem:[%s2580_s7] ss:$0 sm:$0xff]  ;;  %s1677_s7 = sshll.u32 %s2584_s11, 4  ;;  %s1678_s7 = int_to_ptr.hbm [resolvable:$true] %s1677_s7 }
 0x394   :  { %v973_v54 = vunpack.c.l.b16 %v952_v17  ;;  %v839_v61 = vadd.f32 %v2413_v52, %v825_v21 }
 0x396   :  { %v978_v20 = vpack.c.b16 %v973_v54, %v972_v5  ;;  %v849_v56 = vmax.f32 %v839_v61, 0.0 }
 0x398   :  { %1849 = vmatmul.msk.bf16.vlgmr.msrb.gmra.mxu3 %vm326_vm10, %v978_v20 }
 0x399   :  { %v805_v24 = vpop.f32.mrf.mxu2 }
 0x39a   :  { %v826_v26 = vadd.f32 %v805_v24, %v734_v22 }
 0x39c   :  { %v840_v27 = vadd.f32 %v2413_v52, %v826_v26 }
 0x39e   :  { %v850_v30 = vmax.f32 %v840_v27, 0.0 }
 0x3a0   :  { %v948_v32 = vmax.f32 %v849_v56, %v850_v30 }
 0x3a1   :  { %v808_v34 = vpop.f32.mrf.mxu2 }
 0x3a2   :  { %v953_v36 = vpack.c.bf16 %v948_v32, %v948_v32  ;;  %v827_v37 = vadd.f32 %v808_v34, %v2400_v18  ;;  %v831_v18 = vld [vmem:[%s2578_s5] sm:$0x1] }
 0x3a3   :  { %v941_v50 = vadd.f32 %v938_v47, %v831_v18 }
 0x3a4   :  { %v974_v25 = vunpack.c.l.b16 %v953_v36  ;;  %v841_v38 = vadd.f32 %v2413_v52, %v827_v37 }
 0x3a5   :  { %v942_v57 = vmax.f32 %v941_v50, 0.0 }
 0x3a6   :  { %v1046_v39 = vpack.c.b16 %v974_v25, %v973_v54  ;;  %v851_v44 = vmax.f32 %v841_v38, 0.0 }
 0x3a7   :  { %v944_v63 = vperm.slane %v942_v57, 0 }
 0x3a8   :  { %1864 = vmatmul.msk.bf16.gmra.mxu0 %vm326_vm10, %v1046_v39  ;;  %1877 = vmatmul.msk.bf16.vlgmr.msra.gmra.mxu1 %vm326_vm10, %v1046_v39 }
 0x3a9   :  { %v810_v40 = vpop.f32.mrf.mxu2  ;;  %v956_v3 = vpack.c.bf16 %v944_v63, %v944_v63 }
 0x3aa   :  { %v828_v41 = vadd.f32 %v810_v40, %v739_v9 }
 0x3ab   :  { %v977_v51 = vunpack.c.l.b16 %v956_v3 }
 0x3ac   :  { %v842_v42 = vadd.f32 %v2413_v52, %v828_v41 }
 0x3ad   :  { %v981_v11 = vpack.c.b16 %v977_v51, %v977_v51  ;;  %v1113_v14 = vpack.c.b16 %v2214_v0, %v977_v51 }
 0x3ae   :  { %v852_v45 = vmax.f32 %v842_v42, 0.0 }
 0x3b0   :  { %v949_v43 = vmax.f32 %v851_v44, %v852_v45 }
 0x3b1   :  { %v813_v48 = vpop.f32.mrf.mxu2 }
 0x3b2   :  { %v954_v28 = vpack.c.bf16 %v949_v43, %v949_v43  ;;  %v829_v31 = vadd.f32 %v813_v48, %v2406_v33 }
 0x3b4   :  { %v843_v46 = vadd.f32 %v2413_v52, %v829_v31  ;;  %v975_v53 = vunpack.c.l.b16 %v954_v28 }
 0x3b6   :  { %v979_v55 = vpack.c.b16 %v975_v53, %v974_v25  ;;  %v853_v29 = vmax.f32 %v843_v46, 0.0 }
 0x3b8   :  { %1850 = vmatmul.msk.bf16.gmra.mxu3 %vm326_vm10, %v979_v55 }
 0x3b9   :  { %v815_v60 = vpop.f32.mrf.mxu2 }
 0x3ba   :  { %v830_v62 = vadd.f32 %v815_v60, %v744_v58 }
 0x3bc   :  { %v844_v1 = vadd.f32 %v2413_v52, %v830_v62  ;;  %v1981_v52 = vld [vmem:[%s2581_s8 + $0x28] sm:$0xff] }
 0x3bd   :  { %1430 = vmatpush.bf16.msrb.mxu0 %v1981_v52 }
 0x3be   :  { %v854_v2 = vmax.f32 %v844_v1, 0.0 }
 0x3c0   :  { %v950_v33 = vmax.f32 %v853_v29, %v854_v2 }
 0x3c1   :  { %v818_v4 = vpop.f32.mrf.mxu2  ;;  %1431 = vmatpush.bf16.msrb.mxu0 %v1980_v49 }
 0x3c2   :  { %v955_v5 = vpack.c.bf16 %v950_v33, %v950_v33 }
 0x3c4   :  { %v976_v6 = vunpack.c.l.b16 %v955_v5 }
 0x3c6   :  { %v980_v7 = vpack.c.b16 %v977_v51, %v976_v6  ;;  %v1047_v8 = vpack.c.b16 %v976_v6, %v975_v53 }
 0x3c8   :  { %1851 = vmatmul.msk.bf16.gmra.mxu3 %vm326_vm10, %v980_v7  ;;  %1865 = vmatmul.msk.bf16.gmra.mxu0 %vm326_vm10, %v1047_v8 }
 0x3c9   :  { %1878 = vmatmul.msk.bf16.gmra.mxu1 %vm326_vm10, %v1047_v8  ;;  %v819_v10 = vpop.f32.mrf.mxu2 }
 0x3d8   :  { %1852 = vmatmul.msk.bf16.gmra.mxu3 %vm326_vm10, %v981_v11  ;;  %1866 = vmatmul.msk.bf16.gmra.mxu0 %vm326_vm10, %v981_v11 }
 0x3d9   :  { %1879 = vmatmul.msk.bf16.gmra.mxu1 %vm326_vm10, %v981_v11 }
 0x3e8   :  { %1853 = vmatmul.msk.bf16.gmra.mxu3 %vm326_vm10, %v981_v11  ;;  %1867 = vmatmul.msk.bf16.gmra.mxu0 %vm326_vm10, %v981_v11 }
 0x3e9   :  { %1880 = vmatmul.msk.bf16.gmra.mxu1 %vm326_vm10, %v981_v11 }
 0x3f8   :  { %1854 = vmatmul.msk.bf16.gmra.mxu3 %vm326_vm10, %v981_v11  ;;  %1868 = vmatmul.msk.bf16.gmra.mxu0 %vm326_vm10, %v981_v11 }
 0x3f9   :  { %1881 = vmatmul.msk.bf16.gmra.mxu1 %vm326_vm10, %v981_v11 }
 0x405   :  { %v1078_v16 = vpop.f32.mrf.mxu0 }
 0x409   :  { %1882 = vmatmul.msk.bf16.gmra.mxu1 %vm326_vm10, %v1113_v14 }
 0x40d   :  { %v1080_v24 = vpop.f32.mrf.mxu0 }
 0x41b   :  { %v1015_v15 = vpop.f32.mrf.mxu3 }
 0x41c   :  { %v1079_v17 = vadd.f32 %v1078_v16, %v1015_v15 }
 0x423   :  { %v1017_v21 = vpop.f32.mrf.mxu3 }
 0x424   :  { %v1081_v61 = vadd.f32 %v1080_v24, %v1017_v21 }
 0x425   :  { %v1138_v54 = vpop.f32.mrf.mxu1  ;;  %v1083_v25 = vpop.f32.mrf.mxu0 }
 0x426   :  { %v1168_v59 = vadd.f32 %v1138_v54, %v1079_v17 }
 0x428   :  { %v1184_v20 = vadd.f32 %v2477_v19, %v1168_v59 }
 0x42a   :  { %v1196_v22 = vmax.f32 %v1184_v20, 0.0 }
 0x42c   :  { %v1208_v26 = vpack.c.bf16 %v1196_v22, %v1196_v22 }
 0x42d   :  { %v1140_v27 = vpop.f32.mrf.mxu1  ;;  %v1085_v38 = vpop.f32.mrf.mxu0 }
 0x42e   :  { %v1241_v56 = vunpack.c.l.b16 %v1208_v26  ;;  %v1169_v30 = vadd.f32 %v1140_v27, %v1081_v61 }
 0x430   :  { %v1328_v32 = vpack.c.b16 %v1241_v56, %v2214_v0  ;;  %v1185_v34 = vadd.f32 %v2477_v19, %v1169_v30 }
 0x432   :  { %v1197_v36 = vmax.f32 %v1185_v34, 0.0  ;;  %1909 = vmatmul.msk.bf16.vlgmr.msra.gmra.mxu3 %vm326_vm10, %v1328_v32 }
 0x434   :  { %v1209_v37 = vpack.c.bf16 %v1197_v36, %v1197_v36 }
 0x436   :  { %v1242_v39 = vunpack.c.l.b16 %v1209_v37 }
 0x438   :  { %v1253_v9 = vpack.c.b16 %v1242_v39, %v1241_v56 }
 0x43a   :  { %1895 = vmatmul.msk.bf16.vlgmr.msrb.gmra.mxu2 %vm326_vm10, %v1253_v9 }
 0x43b   :  { %v1020_v40 = vpop.f32.mrf.mxu3 }
 0x43c   :  { %v1084_v42 = vadd.f32 %v1083_v25, %v1020_v40 }
 0x443   :  { %v1022_v41 = vpop.f32.mrf.mxu3 }
 0x444   :  { %v1086_v28 = vadd.f32 %v1085_v38, %v1022_v41 }
 0x445   :  { %v1088_v44 = vpop.f32.mrf.mxu0 }
 0x446   :  { %v1143_v45 = vpop.f32.mrf.mxu1 }
 0x447   :  { %v1170_v18 = vadd.f32 %v1143_v45, %v1084_v42 }
 0x449   :  { %v1186_v47 = vadd.f32 %v2477_v19, %v1170_v18 }
 0x44b   :  { %v1198_v43 = vmax.f32 %v1186_v47, 0.0  ;;  %v1025_v48 = vpop.f32.mrf.mxu3 }
 0x44c   :  { %v1089_v63 = vadd.f32 %v1088_v44, %v1025_v48 }
 0x44d   :  { %v1210_v31 = vpack.c.bf16 %v1198_v43, %v1198_v43  ;;  %v1090_v55 = vpop.f32.mrf.mxu0 }
 0x44e   :  { %v1145_v50 = vpop.f32.mrf.mxu1 }
 0x44f   :  { %v1243_v46 = vunpack.c.l.b16 %v1210_v31  ;;  %v1171_v53 = vadd.f32 %v1145_v50, %v1086_v28 }
 0x451   :  { %v1329_v57 = vpack.c.b16 %v1243_v46, %v1242_v39  ;;  %v1187_v58 = vadd.f32 %v2477_v19, %v1171_v53 }
 0x453   :  { %v1199_v60 = vmax.f32 %v1187_v58, 0.0  ;;  %1910 = vmatmul.msk.bf16.gmra.mxu3 %vm326_vm10, %v1329_v57  ;;  %1927 = vmatmul.msk.bf16.vlgmr.msrb.gmra.mxu0 %vm326_vm10, %v1329_v57  ;;  %v1027_v62 = vpop.f32.mrf.mxu3 }
 0x454   :  { %v1091_v7 = vadd.f32 %v1090_v55, %v1027_v62 }
 0x455   :  { %v1211_v1 = vpack.c.bf16 %v1199_v60, %v1199_v60  ;;  %v1093_v5 = vpop.f32.mrf.mxu0 }
 0x456   :  { %v1148_v29 = vpop.f32.mrf.mxu1 }
 0x457   :  { %v1244_v2 = vunpack.c.l.b16 %v1211_v1  ;;  %v1172_v3 = vadd.f32 %v1148_v29, %v1089_v63 }
 0x459   :  { %v1254_v33 = vpack.c.b16 %v1244_v2, %v1243_v46  ;;  %v1188_v4 = vadd.f32 %v2477_v19, %v1172_v3 }
 0x45b   :  { %v1200_v51 = vmax.f32 %v1188_v4, 0.0  ;;  %1896 = vmatmul.msk.bf16.gmra.mxu2 %vm326_vm10, %v1254_v33  ;;  %v1030_v6 = vpop.f32.mrf.mxu3 }
 0x45c   :  { %v1094_v14 = vadd.f32 %v1093_v5, %v1030_v6 }
 0x45d   :  { %v1212_v8 = vpack.c.bf16 %v1200_v51, %v1200_v51  ;;  %v1095_v49 = vpop.f32.mrf.mxu0 }
 0x45e   :  { %v1150_v23 = vpop.f32.mrf.mxu1 }
 0x45f   :  { %v1245_v35 = vunpack.c.l.b16 %v1212_v8  ;;  %v1173_v52 = vadd.f32 %v1150_v23, %v1091_v7 }
 0x461   :  { %v1330_v10 = vpack.c.b16 %v1245_v35, %v1244_v2  ;;  %v1189_v11 = vadd.f32 %v2477_v19, %v1173_v52 }
 0x463   :  { %v1201_v12 = vmax.f32 %v1189_v11, 0.0  ;;  %1911 = vmatmul.msk.bf16.gmra.mxu3 %vm326_vm10, %v1330_v10  ;;  %1928 = vmatmul.msk.bf16.gmra.mxu0 %vm326_vm10, %v1330_v10  ;;  %v1032_v13 = vpop.f32.mrf.mxu3  ;;  %v1934_v10 = vld [vmem:[%s2583_s10 + $0x18] sm:$0xff] }
 0x464   :  { %v1096_v24 = vadd.f32 %v1095_v49, %v1032_v13  ;;  %1532 = vmatpush.msrb.mxu1 %v1934_v10  ;;  %v1944_v49 = vld [vmem:[%s2583_s10 + $0x48] sm:$0xff] }
 0x465   :  { %v1213_v15 = vpack.c.bf16 %v1201_v12, %v1201_v12  ;;  %v1098_v26 = vpop.f32.mrf.mxu0  ;;  %1635 = vmatpush.msrb.mxu3 %v1944_v49 }
 0x466   :  { %v1153_v16 = vpop.f32.mrf.mxu1 }
 0x467   :  { %v1246_v17 = vunpack.c.l.b16 %v1213_v15  ;;  %v1174_v54 = vadd.f32 %v1153_v16, %v1094_v14 }
 0x469   :  { %v1255_v59 = vpack.c.b16 %v1246_v17, %v1245_v35  ;;  %v1190_v20 = vadd.f32 %v2477_v19, %v1174_v54  ;;  %v1510_v54 = vld [vmem:[%s2583_s10 + $0x8] sm:$0xff] }
 0x46b   :  { %v1202_v21 = vmax.f32 %v1190_v20, 0.0  ;;  %1897 = vmatmul.msk.bf16.gmra.mxu2 %vm326_vm10, %v1255_v59  ;;  %v1035_v22 = vpop.f32.mrf.mxu3 }
 0x46c   :  { %v1099_v25 = vadd.f32 %v1098_v26, %v1035_v22  ;;  %v1509_v22 = vld [vmem:[%s2583_s10] sm:$0xff] }
 0x46d   :  { %v1214_v61 = vpack.c.bf16 %v1202_v21, %v1202_v21  ;;  %v1100_v41 = vpop.f32.mrf.mxu0  ;;  %v1940_v21 = vld [vmem:[%s2583_s10 + $0x30] sm:$0xff] }
 0x46e   :  { %v1155_v27 = vpop.f32.mrf.mxu1 }
 0x46f   :  { %v1247_v56 = vunpack.c.l.b16 %v1214_v61  ;;  %v1175_v30 = vadd.f32 %v1155_v27, %v1096_v24  ;;  %v1943_v27 = vld [vmem:[%s2583_s10 + $0x40] sm:$0xff] }
 0x470   :  { %1636 = vmatpush.msrb.mxu3 %v1943_v27 }
 0x471   :  { %v1331_v32 = vpack.c.b16 %v1247_v56, %v1246_v17  ;;  %v1191_v34 = vadd.f32 %v2477_v19, %v1175_v30  ;;  %v1933_v17 = vld [vmem:[%s2583_s10 + $0x10] sm:$0xff] }
 0x472   :  { %1533 = vmatpush.msrb.mxu1 %v1933_v17 }
 0x473   :  { %v1203_v36 = vmax.f32 %v1191_v34, 0.0  ;;  %1912 = vmatmul.msk.bf16.gmra.mxu3 %vm326_vm10, %v1331_v32  ;;  %1929 = vmatmul.msk.bf16.gmra.mxu0 %vm326_vm10, %v1331_v32  ;;  %v1037_v39 = vpop.f32.mrf.mxu3 }
 0x474   :  { %v1101_v18 = vadd.f32 %v1100_v41, %v1037_v39  ;;  %1555 = vmatpush.msra.mxu1 %v1510_v54 }
 0x475   :  { %v1215_v37 = vpack.c.bf16 %v1203_v36, %v1203_v36  ;;  %v1103_v53 = vpop.f32.mrf.mxu0 }
 0x476   :  { %v1158_v9 = vpop.f32.mrf.mxu1  ;;  %1556 = vmatpush.msra.mxu1 %v1509_v22 }
 0x477   :  { %v1248_v40 = vunpack.c.l.b16 %v1215_v37  ;;  %v1176_v38 = vadd.f32 %v1158_v9, %v1099_v25  ;;  %v2538_v25 = vld [vmem:[%s2582_s9] ss:$0 sm:$0xff] }
 0x479   :  { %v1256_v42 = vpack.c.b16 %v1248_v40, %v1247_v56  ;;  %v1192_v44 = vadd.f32 %v2477_v19, %v1176_v38 }
 0x47b   :  { %v1204_v45 = vmax.f32 %v1192_v44, 0.0  ;;  %1898 = vmatmul.msk.bf16.gmra.mxu2 %vm326_vm10, %v1256_v42  ;;  %v1040_v31 = vpop.f32.mrf.mxu3 }
 0x47c   :  { %v1104_v57 = vadd.f32 %v1103_v53, %v1040_v31 }
 0x47d   :  { %v1216_v47 = vpack.c.bf16 %v1204_v45, %v1204_v45  ;;  %v1105_v33 = vpop.f32.mrf.mxu0 }
 0x47e   :  { %v1160_v43 = vpop.f32.mrf.mxu1 }
 0x47f   :  { %v1249_v48 = vunpack.c.l.b16 %v1216_v47  ;;  %v1177_v28 = vadd.f32 %v1160_v43, %v1101_v18 }
 0x481   :  { %v1332_v50 = vpack.c.b16 %v1249_v48, %v1248_v40  ;;  %v1193_v46 = vadd.f32 %v2477_v19, %v1177_v28 }
 0x483   :  { %v1205_v55 = vmax.f32 %v1193_v46, 0.0  ;;  %1913 = vmatmul.msk.bf16.gmra.mxu3 %vm326_vm10, %v1332_v50  ;;  %1930 = vmatmul.msk.bf16.gmra.mxu0 %vm326_vm10, %v1332_v50  ;;  %v1042_v2 = vpop.f32.mrf.mxu3  ;;  %v1938_v50 = vld [vmem:[%s2583_s10 + $0x28] sm:$0xff] }
 0x484   :  { %v1106_v4 = vadd.f32 %v1105_v33, %v1042_v2 }
 0x485   :  { %v1217_v58 = vpack.c.bf16 %v1205_v55, %v1205_v55 }
 0x486   :  { %v1163_v60 = vpop.f32.mrf.mxu1 }
 0x487   :  { %v1250_v62 = vunpack.c.l.b16 %v1217_v58  ;;  %v1178_v63 = vadd.f32 %v1163_v60, %v1104_v57  ;;  %v1937_v57 = vld [vmem:[%s2583_s10 + $0x20] sm:$0xff] }
 0x489   :  { %v1257_v1 = vpack.c.b16 %v1250_v62, %v1249_v48  ;;  %v1194_v29 = vadd.f32 %v2477_v19, %v1178_v63 }
 0x48b   :  { %v1206_v3 = vmax.f32 %v1194_v29, 0.0  ;;  %1899 = vmatmul.msk.bf16.gmra.mxu2 %vm326_vm10, %v1257_v1 }
 0x48d   :  { %v1218_v5 = vpack.c.bf16 %v1206_v3, %v1206_v3 }
 0x48e   :  { %v1165_v51 = vpop.f32.mrf.mxu1 }
 0x48f   :  { %v1251_v6 = vunpack.c.l.b16 %v1218_v5  ;;  %v1179_v7 = vadd.f32 %v1165_v51, %v1106_v4 }
 0x491   :  { %v1333_v8 = vpack.c.b16 %v1251_v6, %v1250_v62  ;;  %v1195_v23 = vadd.f32 %v2477_v19, %v1179_v7  ;;  %v1941_v19 = vld [vmem:[%s2583_s10 + $0x38] sm:$0xff] }
 0x492   :  { %1608 = vmatpush.msra.mxu2 %v1941_v19 }
 0x493   :  { %v1207_v35 = vmax.f32 %v1195_v23, 0.0  ;;  %1914 = vmatmul.msk.bf16.gmra.mxu3 %vm326_vm10, %v1333_v8  ;;  %1931 = vmatmul.msk.bf16.gmra.mxu0 %vm326_vm10, %v1333_v8 }
 0x494   :  { %1609 = vmatpush.msra.mxu2 %v1940_v21 }
 0x495   :  { %v1219_v52 = vpack.c.bf16 %v1207_v35, %v1207_v35 }
 0x497   :  { %v1252_v11 = vunpack.c.l.b16 %v1219_v52 }
 0x499   :  { %v1258_v12 = vpack.c.b16 %v1252_v11, %v1251_v6  ;;  %v1408_v13 = vpack.c.b16 %v2214_v0, %v1252_v11 }
 0x49b   :  { %1900 = vmatmul.msk.bf16.gmra.mxu2 %vm326_vm10, %v1258_v12 }
 0x4a3   :  { %1932 = vmatmul.msk.bf16.gmra.mxu0 %vm326_vm10, %v1408_v13 }
 0x4b5   :  { %v1373_v14 = vpop.f32.mrf.mxu3 }
 0x4bd   :  { %v1298_v15 = vpop.f32.mrf.mxu2  ;;  %v1375_v16 = vpop.f32.mrf.mxu3 }
 0x4be   :  { %v1374_v41 = vadd.f32 %v1373_v14, %v1298_v15 }
 0x4c5   :  { %v1300_v59 = vpop.f32.mrf.mxu2 }
 0x4c6   :  { %v1376_v9 = vadd.f32 %v1375_v16, %v1300_v59 }
 0x4d0   :  { %v1433_v0 = vpop.f32.mrf.mxu0 }
 0x4d1   :  { %v1463_v45 = vadd.f32 %v1433_v0, %v1374_v41  ;;  %v1947_v0 = vld [vmem:[%s2583_s10 + $0x58] sm:$0xff] }
 0x4d3   :  { %v1479_v53 = vadd.f32 %v2538_v25, %v1463_v45 }
 0x4d5   :  { %v1491_v60 = vmax.f32 %v1479_v53, 0.0 }
 0x4d6   :  { %v1378_v20 = vpop.f32.mrf.mxu3 }
 0x4d8   :  { %v1435_v24 = vpop.f32.mrf.mxu0 }
 0x4d9   :  { %v1464_v42 = vadd.f32 %v1435_v24, %v1376_v9 }
 0x4db   :  { %v1480_v28 = vadd.f32 %v2538_v25, %v1464_v42 }
 0x4dd   :  { %v1492_v58 = vmax.f32 %v1480_v28, 0.0 }
 0x4de   :  { %v1303_v61 = vpop.f32.mrf.mxu2  ;;  %v1380_v26 = vpop.f32.mrf.mxu3 }
 0x4df   :  { %v1379_v30 = vadd.f32 %v1378_v20, %v1303_v61  ;;  %v1503_v29 = vmax.f32 %v1491_v60, %v1492_v58  ;;  %v1946_v20 = vld [vmem:[%s2583_s10 + $0x50] sm:$0xff]  ;;  %s2119_s10 = smov [#allocation5]  }
 0x4e0   :  { %v1438_v56 = vpop.f32.mrf.mxu0  ;;  %s1675_s18 = sshll.u32 %s2119_s10, 4  ;;  %s1676_s18 = int_to_ptr.vmem [resolvable:$true] %s1675_s18 }
 0x4e1   :  { %v1465_v32 = vadd.f32 %v1438_v56, %v1379_v30 }
 0x4e3   :  { %v1481_v40 = vadd.f32 %v2538_v25, %v1465_v32 }
 0x4e5   :  { %v1493_v18 = vmax.f32 %v1481_v40, 0.0 }
 0x4e6   :  { %v1305_v34 = vpop.f32.mrf.mxu2  ;;  %v1383_v36 = vpop.f32.mrf.mxu3 }
 0x4e7   :  { %v1381_v37 = vadd.f32 %v1380_v26, %v1305_v34 }
 0x4e8   :  { %v1440_v39 = vpop.f32.mrf.mxu0 }
 0x4e9   :  { %v1466_v38 = vadd.f32 %v1440_v39, %v1381_v37 }
 0x4eb   :  { %v1482_v44 = vadd.f32 %v2538_v25, %v1466_v38 }
 0x4ed   :  { %v1494_v47 = vmax.f32 %v1482_v44, 0.0 }
 0x4ee   :  { %v1308_v43 = vpop.f32.mrf.mxu2  ;;  %v1385_v48 = vpop.f32.mrf.mxu3 }
 0x4ef   :  { %v1504_v31 = vmax.f32 %v1493_v18, %v1494_v47  ;;  %v1384_v55 = vadd.f32 %v1383_v36, %v1308_v43 }
 0x4f0   :  { %v1443_v46 = vpop.f32.mrf.mxu0 }
 0x4f1   :  { %1935 = vmatmul.msk.f32.vlgmr.msrb.gmra.mxu1 %vm1514_vm12, %v1504_v31  ;;  %v1467_v62 = vadd.f32 %v1443_v46, %v1384_v55 }
 0x4f2   :  { %1581 = vmatpush.msrb.mxu1 %v1938_v50 }
 0x4f3   :  { %v1483_v33 = vadd.f32 %v2538_v25, %v1467_v62 }
 0x4f4   :  { %1582 = vmatpush.msrb.mxu1 %v1937_v57 }
 0x4f5   :  { %v1495_v51 = vmax.f32 %v1483_v33, 0.0 }
 0x4f6   :  { %v1310_v63 = vpop.f32.mrf.mxu2  ;;  %v1388_v1 = vpop.f32.mrf.mxu3 }
 0x4f7   :  { %v1386_v2 = vadd.f32 %v1385_v48, %v1310_v63 }
 0x4f8   :  { %v1445_v3 = vpop.f32.mrf.mxu0 }
 0x4f9   :  { %v1468_v4 = vadd.f32 %v1445_v3, %v1386_v2  ;;  %1936 = vmatmul.msk.f32.vlgmr.msra.gmra.mxu1 %vm1514_vm12, %v1503_v29 }
 0x4fa   :  { %1662 = vmatpush.msra.mxu1 %v1947_v0 }
 0x4fb   :  { %v1484_v5 = vadd.f32 %v2538_v25, %v1468_v4 }
 0x4fc   :  { %1663 = vmatpush.msra.mxu1 %v1946_v20 }
 0x4fd   :  { %v1496_v6 = vmax.f32 %v1484_v5, 0.0 }
 0x4fe   :  { %v1313_v7 = vpop.f32.mrf.mxu2  ;;  %v1390_v8 = vpop.f32.mrf.mxu3 }
 0x4ff   :  { %v1505_v23 = vmax.f32 %v1495_v51, %v1496_v6  ;;  %v1389_v52 = vadd.f32 %v1388_v1, %v1313_v7 }
 0x500   :  { %v1448_v35 = vpop.f32.mrf.mxu0 }
 0x501   :  { %1939 = vmatmul.msk.f32.vlgmr.msrb.gmra.mxu1 %vm1514_vm12, %v1505_v23  ;;  %v1469_v10 = vadd.f32 %v1448_v35, %v1389_v52 }
 0x503   :  { %v1485_v49 = vadd.f32 %v2538_v25, %v1469_v10 }
 0x505   :  { %v1497_v16 = vmax.f32 %v1485_v49, 0.0 }
 0x506   :  { %v1315_v11 = vpop.f32.mrf.mxu2  ;;  %v1393_v13 = vpop.f32.mrf.mxu3 }
 0x507   :  { %v1391_v12 = vadd.f32 %v1390_v8, %v1315_v11 }
 0x508   :  { %v1450_v19 = vpop.f32.mrf.mxu0 }
 0x509   :  { %v1470_v14 = vadd.f32 %v1450_v19, %v1391_v12 }
 0x50b   :  { %v1486_v15 = vadd.f32 %v2538_v25, %v1470_v14 }
 0x50d   :  { %v1498_v17 = vmax.f32 %v1486_v15, 0.0 }
 0x50e   :  { %v1318_v54 = vpop.f32.mrf.mxu2  ;;  %v1395_v24 = vpop.f32.mrf.mxu3 }
 0x50f   :  { %v1506_v59 = vmax.f32 %v1497_v16, %v1498_v17  ;;  %v1394_v22 = vadd.f32 %v1393_v13, %v1318_v54 }
 0x510   :  { %v1453_v21 = vpop.f32.mrf.mxu0 }
 0x511   :  { %1942 = vmatmul.msk.f32.vlgmr.msra.gmra.mxu2 %vm1514_vm12, %v1506_v59  ;;  %v1471_v61 = vadd.f32 %v1453_v21, %v1394_v22 }
 0x513   :  { %v1487_v30 = vadd.f32 %v2538_v25, %v1471_v61 }
 0x515   :  { %v1499_v37 = vmax.f32 %v1487_v30, 0.0 }
 0x516   :  { %v1320_v26 = vpop.f32.mrf.mxu2  ;;  %v1398_v36 = vpop.f32.mrf.mxu3 }
 0x517   :  { %v1396_v27 = vadd.f32 %v1395_v24, %v1320_v26 }
 0x518   :  { %v1455_v56 = vpop.f32.mrf.mxu0 }
 0x519   :  { %v1472_v32 = vadd.f32 %v1455_v56, %v1396_v27 }
 0x51b   :  { %v1488_v34 = vadd.f32 %v2538_v25, %v1472_v32 }
 0x51d   :  { %v1500_v39 = vmax.f32 %v1488_v34, 0.0 }
 0x51e   :  { %v1323_v9 = vpop.f32.mrf.mxu2  ;;  %v1400_v44 = vpop.f32.mrf.mxu3 }
 0x51f   :  { %v1507_v40 = vmax.f32 %v1499_v37, %v1500_v39  ;;  %v1399_v41 = vadd.f32 %v1398_v36, %v1323_v9 }
 0x520   :  { %v1458_v38 = vpop.f32.mrf.mxu0 }
 0x521   :  { %1945 = vmatmul.msk.f32.vlgmr.msrb.gmra.mxu3 %vm1514_vm12, %v1507_v40  ;;  %v1473_v42 = vadd.f32 %v1458_v38, %v1399_v41 }
 0x523   :  { %v1489_v43 = vadd.f32 %v2538_v25, %v1473_v42 }
 0x525   :  { %v1501_v31 = vmax.f32 %v1489_v43, 0.0 }
 0x526   :  { %v1325_v45 = vpop.f32.mrf.mxu2 }
 0x527   :  { %v1401_v18 = vadd.f32 %v1400_v44, %v1325_v45 }
 0x528   :  { %v1460_v47 = vpop.f32.mrf.mxu0 }
 0x529   :  { %v1474_v48 = vadd.f32 %v1460_v47, %v1401_v18 }
 0x52b   :  { %v1490_v28 = vadd.f32 %v2538_v25, %v1474_v48 }
 0x52d   :  { %v1502_v50 = vmax.f32 %v1490_v28, 0.0 }
 0x52f   :  { %v1508_v46 = vmax.f32 %v1501_v31, %v1502_v50 }
 0x531   :  { %1948 = vmatmul.msk.f32.vlgmr.msra.gmra.mxu1 %vm1514_vm12, %v1508_v46 }
 0x56e   :  { %v1535_v53 = vpop.f32.mrf.mxu1 }
 0x576   :  { %v1558_v55 = vpop.f32.mrf.mxu1 }
 0x577   :  { %v1559_v58 = vadd.f32 %v1558_v55, %v1535_v53 }
 0x57e   :  { %v1584_v57 = vpop.f32.mrf.mxu1 }
 0x57f   :  { %v1587_v62 = vadd.f32 %v1584_v57, %v1559_v58 }
 0x594   :  { %v1611_v60 = vpop.f32.mrf.mxu2 }
 0x595   :  { %v1614_v1 = vadd.f32 %v1611_v60, %v1587_v62 }
 0x5a4   :  { %v1638_v63 = vpop.f32.mrf.mxu3 }
 0x5a5   :  { %v1641_v25 = vadd.f32 %v1638_v63, %v1614_v1 }
 0x5ae   :  { %v1665_v29 = vpop.f32.mrf.mxu1 }
 0x5af   :  { %v1668_v2 = vadd.f32 %v1665_v29, %v1641_v25 }
 0x5b1   :  { %1669 = vst [vmem:[#allocation5] sm:$0xff] %v1668_v2 }
 0x5b2   :  { %1680 = dma.vmem_to_hbm [thread:$0]  %s1676_s18, 128, %s1678_s7, [#allocation4]  }
 0x5b3   :  { %2111 = dma.done.wait [#allocation4], 128  }
 0x5b4   :  { %2112 = vsyncadd [#allocation4], 4294967168 }
 0x5b5   :  { %1685 = vsyncpa [#allocation3], 1 }
 0x5b6   :  { %1686 = vsyncpa [#allocation4], 1 }

</bundles_post_ra>
